<compile_context>
chip_gen: v5e
topology: v5e:2x2
jax: 0.10.0
libtpu: 0.0.40
codegen_flags: <defaults>
</compile_context>

<pallas_src>
import functools

import jax
import jax.numpy as jnp
from jax import lax
from jax.experimental import pallas as pl
from jax.experimental.pallas import tpu as pltpu


def _edge_decoder_kernel(x_ref, w1_ref, b1_ref, w2_ref, b2_ref, o_ref, *,
                         C, C_mid, H, W):
    """One batch block per grid step.

    x_ref:  (NB, C, H*W)      VMEM input block (flattened spatial on lanes)
    w1_ref: (C_mid*C*9,)      SMEM conv1 weights, BN scale folded in,
                              flattened row-major over (m, c, ky, kx)
    b1_ref: (C_mid,)          SMEM folded conv1 bias (+ BN shift)
    w2_ref: (C_mid,)          SMEM 1x1 conv weights
    b2_ref: (1,)              SMEM conv2 bias
    o_ref:  (NB, 1, H*W)      VMEM lane-dense output block
    """
    NB = x_ref.shape[0]
    HW = H * W

    # Per-input-channel planes, each (NB, HW) with HW on the lane axis.
    planes = [x_ref[:, c, :] for c in range(C)]

    # Output-pixel coordinates along the flattened H*W lane axis.
    pos = lax.broadcasted_iota(jnp.int32, (NB, HW), 1)
    if W & (W - 1) == 0:                       # power-of-two fast path
        ix = pos & (W - 1)
        iy = pos >> (W - 1).bit_length()
    else:
        ix = pos % W
        iy = pos // W

    # conv1 accumulators (one (NB, HW) f32 slab per mid channel), seeded with
    # the BN-folded bias -- no zeros+add pass.
    accs = [jnp.full((NB, HW), b1_ref[m], dtype=jnp.float32)
            for m in range(C_mid)]

    # 3x3 conv: each tap is a lane-roll of the flat plane + border mask
    # (rolls wrap around, so out-of-image taps must be zeroed), followed by
    # scalar(SMEM) x plane FMAs on the VPU.
    for k in range(9):
        dy, dx = k // 3 - 1, k % 3 - 1
        off = dy * W + dx
        if off == 0:
            taps = planes
        else:
            valid = None
            if dx == -1:
                valid = ix >= 1
            elif dx == 1:
                valid = ix <= W - 2
            if dy == -1:
                v = iy >= 1
                valid = v if valid is None else valid & v
            elif dy == 1:
                v = iy <= H - 2
                valid = v if valid is None else valid & v
            shift = (-off) % HW                # rolled[i] = plane[i + off]
            taps = [jnp.where(valid, pltpu.roll(p, shift=shift, axis=1), 0.0)
                    for p in planes]
        for c in range(C):
            tap = taps[c]
            for m in range(C_mid):
                accs[m] = accs[m] + w1_ref[(m * C + c) * 9 + k] * tap

    # ReLU + 1x1 conv as a VPU weighted channel sum; lane-dense store.
    out = jnp.full((NB, HW), b2_ref[0], dtype=jnp.float32)
    for m in range(C_mid):
        out = out + w2_ref[m] * jnp.maximum(accs[m], 0.0)
    o_ref[:, 0, :] = out.astype(o_ref.dtype)


def edge_decoder_forward(x_nchw, params):
    """x_nchw: (N, C, H, W) float32.  Returns (N, 1, H, W) float32."""
    w1, b1 = params["w1"], params["b1"]
    gamma, beta = params["gamma"], params["beta"]
    rm, rv = params["running_mean"], params["running_var"]
    w2, b2 = params["w2"], params["b2"]
    eps = 1e-5

    N, C, H, W = x_nchw.shape
    c_mid = C // 2
    HW = H * W

    # Fold BatchNorm (inference) and the conv1 bias into conv1 weights/bias:
    #   scale = gamma / sqrt(var + eps);  shift = beta - mean * scale
    scale = gamma / jnp.sqrt(rv + eps)                          # (Cmid,)
    shift = beta - rm * scale                                   # (Cmid,)
    w1_folded = (w1 * scale[:, None, None, None]).reshape(-1)   # (Cmid*C*9,)
    b1_folded = b1 * scale + shift                              # (Cmid,)
    w2_flat = w2.reshape(c_mid)                                 # (Cmid,)
    b2_flat = b2.reshape(1)                                     # (1,)

    # Lane-dense layout: flatten spatial dims (free, contiguous reshape).
    x_flat = x_nchw.reshape(N, C, HW)

    # Batch blocking: keep >=2 parallel grid steps when possible (two
    # TensorCores on v7x), each covering as much batch as fits VMEM.
    n_blk = N // 2 if (N >= 2 and N % 2 == 0) else N
    while n_blk % 2 == 0 and n_blk * C * HW * 4 > (8 << 20):
        n_blk //= 2
    grid = (N // n_blk,)
    # TODO(synk): for very large images (e.g. 2048x2048 on v7x's 64 MiB VMEM)
    # add a row-tiled grid axis with a 1-row halo.

    kernel = functools.partial(_edge_decoder_kernel,
                               C=C, C_mid=c_mid, H=H, W=W)

    smem = lambda: pl.BlockSpec(memory_space=pltpu.MemorySpace.SMEM)

    out_flat = pl.pallas_call(
        kernel,
        out_shape=jax.ShapeDtypeStruct((N, 1, HW), jnp.float32),
        grid_spec=pltpu.PrefetchScalarGridSpec(
            num_scalar_prefetch=0,
            grid=grid,
            in_specs=[
                pl.BlockSpec((n_blk, C, HW), lambda g: (g, 0, 0)),
                smem(),   # w1 (BN folded)
                smem(),   # b1 (BN folded)
                smem(),   # w2
                smem(),   # b2
            ],
            out_specs=pl.BlockSpec((n_blk, 1, HW), lambda g: (g, 0, 0)),
        ),
        compiler_params=pltpu.CompilerParams(
            dimension_semantics=("parallel",)),
    )(x_flat, w1_folded, b1_folded, w2_flat, b2_flat)

    return out_flat.reshape(N, 1, H, W)


def _reference_forward(x_nchw, params):
    """Pure-JAX reference (lax.conv) for correctness checking."""
    w1, b1, gamma, beta, rm, rv, w2, b2 = (
        params["w1"], params["b1"], params["gamma"], params["beta"],
        params["running_mean"], params["running_var"], params["w2"],
        params["b2"])
    eps = 1e-5
    x = jnp.transpose(x_nchw, (0, 2, 3, 1))            # NHWC
    w1_hwio = jnp.transpose(w1, (2, 3, 1, 0))          # (3,3,C,Cmid)
    y = lax.conv_general_dilated(x, w1_hwio, (1, 1), "SAME",
                                 dimension_numbers=("NHWC", "HWIO", "NHWC"))
    y = y + b1
    y = (y - rm) / jnp.sqrt(rv + eps) * gamma + beta
    y = jnp.maximum(y, 0.0)
    w2_hwio = jnp.transpose(w2, (2, 3, 1, 0))          # (1,1,Cmid,1)
    y = lax.conv_general_dilated(y, w2_hwio, (1, 1), "SAME",
                                 dimension_numbers=("NHWC", "HWIO", "NHWC"))
    y = y + b2
    return jnp.transpose(y, (0, 3, 1, 2))


def init_params(key, in_channels):
    c_mid = in_channels // 2
    ks = jax.random.split(key, 8)
    return {
        "w1": jax.random.normal(ks[0], (c_mid, in_channels, 3, 3), jnp.float32) * 0.1,
        "b1": jax.random.normal(ks[1], (c_mid,), jnp.float32) * 0.1,
        "gamma": 1.0 + 0.1 * jax.random.normal(ks[2], (c_mid,), jnp.float32),
        "beta": 0.1 * jax.random.normal(ks[3], (c_mid,), jnp.float32),
        "running_mean": 0.1 * jax.random.normal(ks[4], (c_mid,), jnp.float32),
        "running_var": 1.0 + 0.1 * jnp.abs(jax.random.normal(ks[5], (c_mid,), jnp.float32)),
        "w2": jax.random.normal(ks[6], (1, c_mid, 1, 1), jnp.float32) * 0.1,
        "b2": jax.random.normal(ks[7], (1,), jnp.float32) * 0.1,
    }


if __name__ == "__main__":
    key = jax.random.PRNGKey(0)
    k_x, k_p = jax.random.split(key)

    N, C, H, W = 2, 4, 16, 16
    x = jax.random.normal(k_x, (N, C, H, W), jnp.float32)
    params = init_params(k_p, C)

    out = edge_decoder_forward(x, params)
    out = jax.block_until_ready(out)

    ref = _reference_forward(x, params)
    assert out.shape == (N, 1, H, W), out.shape
    assert jnp.allclose(out, ref, rtol=1e-4, atol=1e-4), \
        float(jnp.max(jnp.abs(out - ref)))

    print("KERNEL_OK")
</pallas_src>

<mosaic_0001>
module attributes {stable_mosaic.version = 11 : i64} {
  func.func @_edge_decoder_kernel(%arg0: i32, %arg1: memref<1x4x256xf32, #tpu.memory_space<vmem>>, %arg2: memref<72xf32, #tpu.memory_space<smem>>, %arg3: memref<2xf32, #tpu.memory_space<smem>>, %arg4: memref<2xf32, #tpu.memory_space<smem>>, %arg5: memref<1xf32, #tpu.memory_space<smem>>, %arg6: memref<1x1x256xf32, #tpu.memory_space<vmem>>) attributes {dimension_semantics = [#tpu.dimension_semantics<parallel>], iteration_bounds = array<i64: 2>, scalar_prefetch = 0 : i64, scratch_operands = 0 : i64, tpu.core_type = #tpu.core_type<tc>, window_params = [{transform_indices = @transform_0, window_bounds = array<i64: 1, 4, 256>}, {transform_indices = @transform_1, window_bounds = array<i64: 72>}, {transform_indices = @transform_2, window_bounds = array<i64: 2>}, {transform_indices = @transform_3, window_bounds = array<i64: 2>}, {transform_indices = @transform_4, window_bounds = array<i64: 1>}, {transform_indices = @transform_5, window_bounds = array<i64: 1, 1, 256>}]} {
    %c0 = arith.constant 0 : index
    %c0_0 = arith.constant 0 : index
    %c0_1 = arith.constant 0 : index
    %0 = vector.load %arg1[%c0, %c0_0, %c0_1] : memref<1x4x256xf32, #tpu.memory_space<vmem>>, vector<1x1x256xf32>
    %1 = vector.shape_cast %0 : vector<1x1x256xf32> to vector<1x256xf32>
    %c0_2 = arith.constant 0 : index
    %c1 = arith.constant 1 : index
    %c0_3 = arith.constant 0 : index
    %2 = vector.load %arg1[%c0_2, %c1, %c0_3] : memref<1x4x256xf32, #tpu.memory_space<vmem>>, vector<1x1x256xf32>
    %3 = vector.shape_cast %2 : vector<1x1x256xf32> to vector<1x256xf32>
    %c0_4 = arith.constant 0 : index
    %c2 = arith.constant 2 : index
    %c0_5 = arith.constant 0 : index
    %4 = vector.load %arg1[%c0_4, %c2, %c0_5] : memref<1x4x256xf32, #tpu.memory_space<vmem>>, vector<1x1x256xf32>
    %5 = vector.shape_cast %4 : vector<1x1x256xf32> to vector<1x256xf32>
    %c0_6 = arith.constant 0 : index
    %c3 = arith.constant 3 : index
    %c0_7 = arith.constant 0 : index
    %6 = vector.load %arg1[%c0_6, %c3, %c0_7] : memref<1x4x256xf32, #tpu.memory_space<vmem>>, vector<1x1x256xf32>
    %7 = vector.shape_cast %6 : vector<1x1x256xf32> to vector<1x256xf32>
    %8 = tpu.iota {dimensions = array<i32: 1>} : vector<1x256xi32>
    %c15_i32 = arith.constant 15 : i32
    %9 = vector.broadcast %c15_i32 : i32 to vector<1x256xi32>
    %10 = arith.andi %8, %9 : vector<1x256xi32>
    %c4_i32 = arith.constant 4 : i32
    %11 = vector.broadcast %c4_i32 : i32 to vector<1x256xi32>
    %12 = arith.shrsi %8, %11 : vector<1x256xi32>
    %c0_8 = arith.constant 0 : index
    %13 = memref.load %arg3[%c0_8] : memref<2xf32, #tpu.memory_space<smem>>
    %14 = vector.broadcast %13 : f32 to vector<1x256xf32>
    %c1_9 = arith.constant 1 : index
    %15 = memref.load %arg3[%c1_9] : memref<2xf32, #tpu.memory_space<smem>>
    %16 = vector.broadcast %15 : f32 to vector<1x256xf32>
    %c1_i32 = arith.constant 1 : i32
    %17 = vector.broadcast %c1_i32 : i32 to vector<1x256xi32>
    %18 = arith.cmpi sge, %10, %17 : vector<1x256xi32>
    %c1_i32_10 = arith.constant 1 : i32
    %19 = vector.broadcast %c1_i32_10 : i32 to vector<1x256xi32>
    %20 = arith.cmpi sge, %12, %19 : vector<1x256xi32>
    %21 = arith.andi %18, %20 : vector<1x256xi1>
    %c17_i32 = arith.constant 17 : i32
    %22 = tpu.dynamic_rotate %1 by %c17_i32 dim 1 : vector<1x256xf32>, i32 -> vector<1x256xf32>
    %cst = arith.constant 0.000000e+00 : f32
    %23 = vector.broadcast %cst : f32 to vector<1x256xf32>
    %24 = arith.select %21, %22, %23 : vector<1x256xi1>, vector<1x256xf32>
    %c17_i32_11 = arith.constant 17 : i32
    %25 = tpu.dynamic_rotate %3 by %c17_i32_11 dim 1 : vector<1x256xf32>, i32 -> vector<1x256xf32>
    %cst_12 = arith.constant 0.000000e+00 : f32
    %26 = vector.broadcast %cst_12 : f32 to vector<1x256xf32>
    %27 = arith.select %21, %25, %26 : vector<1x256xi1>, vector<1x256xf32>
    %c17_i32_13 = arith.constant 17 : i32
    %28 = tpu.dynamic_rotate %5 by %c17_i32_13 dim 1 : vector<1x256xf32>, i32 -> vector<1x256xf32>
    %cst_14 = arith.constant 0.000000e+00 : f32
    %29 = vector.broadcast %cst_14 : f32 to vector<1x256xf32>
    %30 = arith.select %21, %28, %29 : vector<1x256xi1>, vector<1x256xf32>
    %c17_i32_15 = arith.constant 17 : i32
    %31 = tpu.dynamic_rotate %7 by %c17_i32_15 dim 1 : vector<1x256xf32>, i32 -> vector<1x256xf32>
    %cst_16 = arith.constant 0.000000e+00 : f32
    %32 = vector.broadcast %cst_16 : f32 to vector<1x256xf32>
    %33 = arith.select %21, %31, %32 : vector<1x256xi1>, vector<1x256xf32>
    %c0_17 = arith.constant 0 : index
    %34 = memref.load %arg2[%c0_17] : memref<72xf32, #tpu.memory_space<smem>>
    %35 = vector.broadcast %34 : f32 to vector<1x256xf32>
    %36 = arith.mulf %35, %24 : vector<1x256xf32>
    %37 = arith.addf %14, %36 : vector<1x256xf32>
    %c36 = arith.constant 36 : index
    %38 = memref.load %arg2[%c36] : memref<72xf32, #tpu.memory_space<smem>>
    %39 = vector.broadcast %38 : f32 to vector<1x256xf32>
    %40 = arith.mulf %39, %24 : vector<1x256xf32>
    %41 = arith.addf %16, %40 : vector<1x256xf32>
    %c9 = arith.constant 9 : index
    %42 = memref.load %arg2[%c9] : memref<72xf32, #tpu.memory_space<smem>>
    %43 = vector.broadcast %42 : f32 to vector<1x256xf32>
    %44 = arith.mulf %43, %27 : vector<1x256xf32>
    %45 = arith.addf %37, %44 : vector<1x256xf32>
    %c45 = arith.constant 45 : index
    %46 = memref.load %arg2[%c45] : memref<72xf32, #tpu.memory_space<smem>>
    %47 = vector.broadcast %46 : f32 to vector<1x256xf32>
    %48 = arith.mulf %47, %27 : vector<1x256xf32>
    %49 = arith.addf %41, %48 : vector<1x256xf32>
    %c18 = arith.constant 18 : index
    %50 = memref.load %arg2[%c18] : memref<72xf32, #tpu.memory_space<smem>>
    %51 = vector.broadcast %50 : f32 to vector<1x256xf32>
    %52 = arith.mulf %51, %30 : vector<1x256xf32>
    %53 = arith.addf %45, %52 : vector<1x256xf32>
    %c54 = arith.constant 54 : index
    %54 = memref.load %arg2[%c54] : memref<72xf32, #tpu.memory_space<smem>>
    %55 = vector.broadcast %54 : f32 to vector<1x256xf32>
    %56 = arith.mulf %55, %30 : vector<1x256xf32>
    %57 = arith.addf %49, %56 : vector<1x256xf32>
    %c27 = arith.constant 27 : index
    %58 = memref.load %arg2[%c27] : memref<72xf32, #tpu.memory_space<smem>>
    %59 = vector.broadcast %58 : f32 to vector<1x256xf32>
    %60 = arith.mulf %59, %33 : vector<1x256xf32>
    %61 = arith.addf %53, %60 : vector<1x256xf32>
    %c63 = arith.constant 63 : index
    %62 = memref.load %arg2[%c63] : memref<72xf32, #tpu.memory_space<smem>>
    %63 = vector.broadcast %62 : f32 to vector<1x256xf32>
    %64 = arith.mulf %63, %33 : vector<1x256xf32>
    %65 = arith.addf %57, %64 : vector<1x256xf32>
    %c1_i32_18 = arith.constant 1 : i32
    %66 = vector.broadcast %c1_i32_18 : i32 to vector<1x256xi32>
    %67 = arith.cmpi sge, %12, %66 : vector<1x256xi32>
    %c16_i32 = arith.constant 16 : i32
    %68 = tpu.dynamic_rotate %1 by %c16_i32 dim 1 : vector<1x256xf32>, i32 -> vector<1x256xf32>
    %cst_19 = arith.constant 0.000000e+00 : f32
    %69 = vector.broadcast %cst_19 : f32 to vector<1x256xf32>
    %70 = arith.select %67, %68, %69 : vector<1x256xi1>, vector<1x256xf32>
    %c16_i32_20 = arith.constant 16 : i32
    %71 = tpu.dynamic_rotate %3 by %c16_i32_20 dim 1 : vector<1x256xf32>, i32 -> vector<1x256xf32>
    %cst_21 = arith.constant 0.000000e+00 : f32
    %72 = vector.broadcast %cst_21 : f32 to vector<1x256xf32>
    %73 = arith.select %67, %71, %72 : vector<1x256xi1>, vector<1x256xf32>
    %c16_i32_22 = arith.constant 16 : i32
    %74 = tpu.dynamic_rotate %5 by %c16_i32_22 dim 1 : vector<1x256xf32>, i32 -> vector<1x256xf32>
    %cst_23 = arith.constant 0.000000e+00 : f32
    %75 = vector.broadcast %cst_23 : f32 to vector<1x256xf32>
    %76 = arith.select %67, %74, %75 : vector<1x256xi1>, vector<1x256xf32>
    %c16_i32_24 = arith.constant 16 : i32
    %77 = tpu.dynamic_rotate %7 by %c16_i32_24 dim 1 : vector<1x256xf32>, i32 -> vector<1x256xf32>
    %cst_25 = arith.constant 0.000000e+00 : f32
    %78 = vector.broadcast %cst_25 : f32 to vector<1x256xf32>
    %79 = arith.select %67, %77, %78 : vector<1x256xi1>, vector<1x256xf32>
    %c1_26 = arith.constant 1 : index
    %80 = memref.load %arg2[%c1_26] : memref<72xf32, #tpu.memory_space<smem>>
    %81 = vector.broadcast %80 : f32 to vector<1x256xf32>
    %82 = arith.mulf %81, %70 : vector<1x256xf32>
    %83 = arith.addf %61, %82 : vector<1x256xf32>
    %c37 = arith.constant 37 : index
    %84 = memref.load %arg2[%c37] : memref<72xf32, #tpu.memory_space<smem>>
    %85 = vector.broadcast %84 : f32 to vector<1x256xf32>
    %86 = arith.mulf %85, %70 : vector<1x256xf32>
    %87 = arith.addf %65, %86 : vector<1x256xf32>
    %c10 = arith.constant 10 : index
    %88 = memref.load %arg2[%c10] : memref<72xf32, #tpu.memory_space<smem>>
    %89 = vector.broadcast %88 : f32 to vector<1x256xf32>
    %90 = arith.mulf %89, %73 : vector<1x256xf32>
    %91 = arith.addf %83, %90 : vector<1x256xf32>
    %c46 = arith.constant 46 : index
    %92 = memref.load %arg2[%c46] : memref<72xf32, #tpu.memory_space<smem>>
    %93 = vector.broadcast %92 : f32 to vector<1x256xf32>
    %94 = arith.mulf %93, %73 : vector<1x256xf32>
    %95 = arith.addf %87, %94 : vector<1x256xf32>
    %c19 = arith.constant 19 : index
    %96 = memref.load %arg2[%c19] : memref<72xf32, #tpu.memory_space<smem>>
    %97 = vector.broadcast %96 : f32 to vector<1x256xf32>
    %98 = arith.mulf %97, %76 : vector<1x256xf32>
    %99 = arith.addf %91, %98 : vector<1x256xf32>
    %c55 = arith.constant 55 : index
    %100 = memref.load %arg2[%c55] : memref<72xf32, #tpu.memory_space<smem>>
    %101 = vector.broadcast %100 : f32 to vector<1x256xf32>
    %102 = arith.mulf %101, %76 : vector<1x256xf32>
    %103 = arith.addf %95, %102 : vector<1x256xf32>
    %c28 = arith.constant 28 : index
    %104 = memref.load %arg2[%c28] : memref<72xf32, #tpu.memory_space<smem>>
    %105 = vector.broadcast %104 : f32 to vector<1x256xf32>
    %106 = arith.mulf %105, %79 : vector<1x256xf32>
    %107 = arith.addf %99, %106 : vector<1x256xf32>
    %c64 = arith.constant 64 : index
    %108 = memref.load %arg2[%c64] : memref<72xf32, #tpu.memory_space<smem>>
    %109 = vector.broadcast %108 : f32 to vector<1x256xf32>
    %110 = arith.mulf %109, %79 : vector<1x256xf32>
    %111 = arith.addf %103, %110 : vector<1x256xf32>
    %c14_i32 = arith.constant 14 : i32
    %112 = vector.broadcast %c14_i32 : i32 to vector<1x256xi32>
    %113 = arith.cmpi sle, %10, %112 : vector<1x256xi32>
    %c1_i32_27 = arith.constant 1 : i32
    %114 = vector.broadcast %c1_i32_27 : i32 to vector<1x256xi32>
    %115 = arith.cmpi sge, %12, %114 : vector<1x256xi32>
    %116 = arith.andi %113, %115 : vector<1x256xi1>
    %c15_i32_28 = arith.constant 15 : i32
    %117 = tpu.dynamic_rotate %1 by %c15_i32_28 dim 1 : vector<1x256xf32>, i32 -> vector<1x256xf32>
    %cst_29 = arith.constant 0.000000e+00 : f32
    %118 = vector.broadcast %cst_29 : f32 to vector<1x256xf32>
    %119 = arith.select %116, %117, %118 : vector<1x256xi1>, vector<1x256xf32>
    %c15_i32_30 = arith.constant 15 : i32
    %120 = tpu.dynamic_rotate %3 by %c15_i32_30 dim 1 : vector<1x256xf32>, i32 -> vector<1x256xf32>
    %cst_31 = arith.constant 0.000000e+00 : f32
    %121 = vector.broadcast %cst_31 : f32 to vector<1x256xf32>
    %122 = arith.select %116, %120, %121 : vector<1x256xi1>, vector<1x256xf32>
    %c15_i32_32 = arith.constant 15 : i32
    %123 = tpu.dynamic_rotate %5 by %c15_i32_32 dim 1 : vector<1x256xf32>, i32 -> vector<1x256xf32>
    %cst_33 = arith.constant 0.000000e+00 : f32
    %124 = vector.broadcast %cst_33 : f32 to vector<1x256xf32>
    %125 = arith.select %116, %123, %124 : vector<1x256xi1>, vector<1x256xf32>
    %c15_i32_34 = arith.constant 15 : i32
    %126 = tpu.dynamic_rotate %7 by %c15_i32_34 dim 1 : vector<1x256xf32>, i32 -> vector<1x256xf32>
    %cst_35 = arith.constant 0.000000e+00 : f32
    %127 = vector.broadcast %cst_35 : f32 to vector<1x256xf32>
    %128 = arith.select %116, %126, %127 : vector<1x256xi1>, vector<1x256xf32>
    %c2_36 = arith.constant 2 : index
    %129 = memref.load %arg2[%c2_36] : memref<72xf32, #tpu.memory_space<smem>>
    %130 = vector.broadcast %129 : f32 to vector<1x256xf32>
    %131 = arith.mulf %130, %119 : vector<1x256xf32>
    %132 = arith.addf %107, %131 : vector<1x256xf32>
    %c38 = arith.constant 38 : index
    %133 = memref.load %arg2[%c38] : memref<72xf32, #tpu.memory_space<smem>>
    %134 = vector.broadcast %133 : f32 to vector<1x256xf32>
    %135 = arith.mulf %134, %119 : vector<1x256xf32>
    %136 = arith.addf %111, %135 : vector<1x256xf32>
    %c11 = arith.constant 11 : index
    %137 = memref.load %arg2[%c11] : memref<72xf32, #tpu.memory_space<smem>>
    %138 = vector.broadcast %137 : f32 to vector<1x256xf32>
    %139 = arith.mulf %138, %122 : vector<1x256xf32>
    %140 = arith.addf %132, %139 : vector<1x256xf32>
    %c47 = arith.constant 47 : index
    %141 = memref.load %arg2[%c47] : memref<72xf32, #tpu.memory_space<smem>>
    %142 = vector.broadcast %141 : f32 to vector<1x256xf32>
    %143 = arith.mulf %142, %122 : vector<1x256xf32>
    %144 = arith.addf %136, %143 : vector<1x256xf32>
    %c20 = arith.constant 20 : index
    %145 = memref.load %arg2[%c20] : memref<72xf32, #tpu.memory_space<smem>>
    %146 = vector.broadcast %145 : f32 to vector<1x256xf32>
    %147 = arith.mulf %146, %125 : vector<1x256xf32>
    %148 = arith.addf %140, %147 : vector<1x256xf32>
    %c56 = arith.constant 56 : index
    %149 = memref.load %arg2[%c56] : memref<72xf32, #tpu.memory_space<smem>>
    %150 = vector.broadcast %149 : f32 to vector<1x256xf32>
    %151 = arith.mulf %150, %125 : vector<1x256xf32>
    %152 = arith.addf %144, %151 : vector<1x256xf32>
    %c29 = arith.constant 29 : index
    %153 = memref.load %arg2[%c29] : memref<72xf32, #tpu.memory_space<smem>>
    %154 = vector.broadcast %153 : f32 to vector<1x256xf32>
    %155 = arith.mulf %154, %128 : vector<1x256xf32>
    %156 = arith.addf %148, %155 : vector<1x256xf32>
    %c65 = arith.constant 65 : index
    %157 = memref.load %arg2[%c65] : memref<72xf32, #tpu.memory_space<smem>>
    %158 = vector.broadcast %157 : f32 to vector<1x256xf32>
    %159 = arith.mulf %158, %128 : vector<1x256xf32>
    %160 = arith.addf %152, %159 : vector<1x256xf32>
    %c1_i32_37 = arith.constant 1 : i32
    %161 = vector.broadcast %c1_i32_37 : i32 to vector<1x256xi32>
    %162 = arith.cmpi sge, %10, %161 : vector<1x256xi32>
    %c1_i32_38 = arith.constant 1 : i32
    %163 = tpu.dynamic_rotate %1 by %c1_i32_38 dim 1 : vector<1x256xf32>, i32 -> vector<1x256xf32>
    %cst_39 = arith.constant 0.000000e+00 : f32
    %164 = vector.broadcast %cst_39 : f32 to vector<1x256xf32>
    %165 = arith.select %162, %163, %164 : vector<1x256xi1>, vector<1x256xf32>
    %c1_i32_40 = arith.constant 1 : i32
    %166 = tpu.dynamic_rotate %3 by %c1_i32_40 dim 1 : vector<1x256xf32>, i32 -> vector<1x256xf32>
    %cst_41 = arith.constant 0.000000e+00 : f32
    %167 = vector.broadcast %cst_41 : f32 to vector<1x256xf32>
    %168 = arith.select %162, %166, %167 : vector<1x256xi1>, vector<1x256xf32>
    %c1_i32_42 = arith.constant 1 : i32
    %169 = tpu.dynamic_rotate %5 by %c1_i32_42 dim 1 : vector<1x256xf32>, i32 -> vector<1x256xf32>
    %cst_43 = arith.constant 0.000000e+00 : f32
    %170 = vector.broadcast %cst_43 : f32 to vector<1x256xf32>
    %171 = arith.select %162, %169, %170 : vector<1x256xi1>, vector<1x256xf32>
    %c1_i32_44 = arith.constant 1 : i32
    %172 = tpu.dynamic_rotate %7 by %c1_i32_44 dim 1 : vector<1x256xf32>, i32 -> vector<1x256xf32>
    %cst_45 = arith.constant 0.000000e+00 : f32
    %173 = vector.broadcast %cst_45 : f32 to vector<1x256xf32>
    %174 = arith.select %162, %172, %173 : vector<1x256xi1>, vector<1x256xf32>
    %c3_46 = arith.constant 3 : index
    %175 = memref.load %arg2[%c3_46] : memref<72xf32, #tpu.memory_space<smem>>
    %176 = vector.broadcast %175 : f32 to vector<1x256xf32>
    %177 = arith.mulf %176, %165 : vector<1x256xf32>
    %178 = arith.addf %156, %177 : vector<1x256xf32>
    %c39 = arith.constant 39 : index
    %179 = memref.load %arg2[%c39] : memref<72xf32, #tpu.memory_space<smem>>
    %180 = vector.broadcast %179 : f32 to vector<1x256xf32>
    %181 = arith.mulf %180, %165 : vector<1x256xf32>
    %182 = arith.addf %160, %181 : vector<1x256xf32>
    %c12 = arith.constant 12 : index
    %183 = memref.load %arg2[%c12] : memref<72xf32, #tpu.memory_space<smem>>
    %184 = vector.broadcast %183 : f32 to vector<1x256xf32>
    %185 = arith.mulf %184, %168 : vector<1x256xf32>
    %186 = arith.addf %178, %185 : vector<1x256xf32>
    %c48 = arith.constant 48 : index
    %187 = memref.load %arg2[%c48] : memref<72xf32, #tpu.memory_space<smem>>
    %188 = vector.broadcast %187 : f32 to vector<1x256xf32>
    %189 = arith.mulf %188, %168 : vector<1x256xf32>
    %190 = arith.addf %182, %189 : vector<1x256xf32>
    %c21 = arith.constant 21 : index
    %191 = memref.load %arg2[%c21] : memref<72xf32, #tpu.memory_space<smem>>
    %192 = vector.broadcast %191 : f32 to vector<1x256xf32>
    %193 = arith.mulf %192, %171 : vector<1x256xf32>
    %194 = arith.addf %186, %193 : vector<1x256xf32>
    %c57 = arith.constant 57 : index
    %195 = memref.load %arg2[%c57] : memref<72xf32, #tpu.memory_space<smem>>
    %196 = vector.broadcast %195 : f32 to vector<1x256xf32>
    %197 = arith.mulf %196, %171 : vector<1x256xf32>
    %198 = arith.addf %190, %197 : vector<1x256xf32>
    %c30 = arith.constant 30 : index
    %199 = memref.load %arg2[%c30] : memref<72xf32, #tpu.memory_space<smem>>
    %200 = vector.broadcast %199 : f32 to vector<1x256xf32>
    %201 = arith.mulf %200, %174 : vector<1x256xf32>
    %202 = arith.addf %194, %201 : vector<1x256xf32>
    %c66 = arith.constant 66 : index
    %203 = memref.load %arg2[%c66] : memref<72xf32, #tpu.memory_space<smem>>
    %204 = vector.broadcast %203 : f32 to vector<1x256xf32>
    %205 = arith.mulf %204, %174 : vector<1x256xf32>
    %206 = arith.addf %198, %205 : vector<1x256xf32>
    %c4 = arith.constant 4 : index
    %207 = memref.load %arg2[%c4] : memref<72xf32, #tpu.memory_space<smem>>
    %208 = vector.broadcast %207 : f32 to vector<1x256xf32>
    %209 = arith.mulf %208, %1 : vector<1x256xf32>
    %210 = arith.addf %202, %209 : vector<1x256xf32>
    %c40 = arith.constant 40 : index
    %211 = memref.load %arg2[%c40] : memref<72xf32, #tpu.memory_space<smem>>
    %212 = vector.broadcast %211 : f32 to vector<1x256xf32>
    %213 = arith.mulf %212, %1 : vector<1x256xf32>
    %214 = arith.addf %206, %213 : vector<1x256xf32>
    %c13 = arith.constant 13 : index
    %215 = memref.load %arg2[%c13] : memref<72xf32, #tpu.memory_space<smem>>
    %216 = vector.broadcast %215 : f32 to vector<1x256xf32>
    %217 = arith.mulf %216, %3 : vector<1x256xf32>
    %218 = arith.addf %210, %217 : vector<1x256xf32>
    %c49 = arith.constant 49 : index
    %219 = memref.load %arg2[%c49] : memref<72xf32, #tpu.memory_space<smem>>
    %220 = vector.broadcast %219 : f32 to vector<1x256xf32>
    %221 = arith.mulf %220, %3 : vector<1x256xf32>
    %222 = arith.addf %214, %221 : vector<1x256xf32>
    %c22 = arith.constant 22 : index
    %223 = memref.load %arg2[%c22] : memref<72xf32, #tpu.memory_space<smem>>
    %224 = vector.broadcast %223 : f32 to vector<1x256xf32>
    %225 = arith.mulf %224, %5 : vector<1x256xf32>
    %226 = arith.addf %218, %225 : vector<1x256xf32>
    %c58 = arith.constant 58 : index
    %227 = memref.load %arg2[%c58] : memref<72xf32, #tpu.memory_space<smem>>
    %228 = vector.broadcast %227 : f32 to vector<1x256xf32>
    %229 = arith.mulf %228, %5 : vector<1x256xf32>
    %230 = arith.addf %222, %229 : vector<1x256xf32>
    %c31 = arith.constant 31 : index
    %231 = memref.load %arg2[%c31] : memref<72xf32, #tpu.memory_space<smem>>
    %232 = vector.broadcast %231 : f32 to vector<1x256xf32>
    %233 = arith.mulf %232, %7 : vector<1x256xf32>
    %234 = arith.addf %226, %233 : vector<1x256xf32>
    %c67 = arith.constant 67 : index
    %235 = memref.load %arg2[%c67] : memref<72xf32, #tpu.memory_space<smem>>
    %236 = vector.broadcast %235 : f32 to vector<1x256xf32>
    %237 = arith.mulf %236, %7 : vector<1x256xf32>
    %238 = arith.addf %230, %237 : vector<1x256xf32>
    %c14_i32_47 = arith.constant 14 : i32
    %239 = vector.broadcast %c14_i32_47 : i32 to vector<1x256xi32>
    %240 = arith.cmpi sle, %10, %239 : vector<1x256xi32>
    %c255_i32 = arith.constant 255 : i32
    %241 = tpu.dynamic_rotate %1 by %c255_i32 dim 1 : vector<1x256xf32>, i32 -> vector<1x256xf32>
    %cst_48 = arith.constant 0.000000e+00 : f32
    %242 = vector.broadcast %cst_48 : f32 to vector<1x256xf32>
    %243 = arith.select %240, %241, %242 : vector<1x256xi1>, vector<1x256xf32>
    %c255_i32_49 = arith.constant 255 : i32
    %244 = tpu.dynamic_rotate %3 by %c255_i32_49 dim 1 : vector<1x256xf32>, i32 -> vector<1x256xf32>
    %cst_50 = arith.constant 0.000000e+00 : f32
    %245 = vector.broadcast %cst_50 : f32 to vector<1x256xf32>
    %246 = arith.select %240, %244, %245 : vector<1x256xi1>, vector<1x256xf32>
    %c255_i32_51 = arith.constant 255 : i32
    %247 = tpu.dynamic_rotate %5 by %c255_i32_51 dim 1 : vector<1x256xf32>, i32 -> vector<1x256xf32>
    %cst_52 = arith.constant 0.000000e+00 : f32
    %248 = vector.broadcast %cst_52 : f32 to vector<1x256xf32>
    %249 = arith.select %240, %247, %248 : vector<1x256xi1>, vector<1x256xf32>
    %c255_i32_53 = arith.constant 255 : i32
    %250 = tpu.dynamic_rotate %7 by %c255_i32_53 dim 1 : vector<1x256xf32>, i32 -> vector<1x256xf32>
    %cst_54 = arith.constant 0.000000e+00 : f32
    %251 = vector.broadcast %cst_54 : f32 to vector<1x256xf32>
    %252 = arith.select %240, %250, %251 : vector<1x256xi1>, vector<1x256xf32>
    %c5 = arith.constant 5 : index
    %253 = memref.load %arg2[%c5] : memref<72xf32, #tpu.memory_space<smem>>
    %254 = vector.broadcast %253 : f32 to vector<1x256xf32>
    %255 = arith.mulf %254, %243 : vector<1x256xf32>
    %256 = arith.addf %234, %255 : vector<1x256xf32>
    %c41 = arith.constant 41 : index
    %257 = memref.load %arg2[%c41] : memref<72xf32, #tpu.memory_space<smem>>
    %258 = vector.broadcast %257 : f32 to vector<1x256xf32>
    %259 = arith.mulf %258, %243 : vector<1x256xf32>
    %260 = arith.addf %238, %259 : vector<1x256xf32>
    %c14 = arith.constant 14 : index
    %261 = memref.load %arg2[%c14] : memref<72xf32, #tpu.memory_space<smem>>
    %262 = vector.broadcast %261 : f32 to vector<1x256xf32>
    %263 = arith.mulf %262, %246 : vector<1x256xf32>
    %264 = arith.addf %256, %263 : vector<1x256xf32>
    %c50 = arith.constant 50 : index
    %265 = memref.load %arg2[%c50] : memref<72xf32, #tpu.memory_space<smem>>
    %266 = vector.broadcast %265 : f32 to vector<1x256xf32>
    %267 = arith.mulf %266, %246 : vector<1x256xf32>
    %268 = arith.addf %260, %267 : vector<1x256xf32>
    %c23 = arith.constant 23 : index
    %269 = memref.load %arg2[%c23] : memref<72xf32, #tpu.memory_space<smem>>
    %270 = vector.broadcast %269 : f32 to vector<1x256xf32>
    %271 = arith.mulf %270, %249 : vector<1x256xf32>
    %272 = arith.addf %264, %271 : vector<1x256xf32>
    %c59 = arith.constant 59 : index
    %273 = memref.load %arg2[%c59] : memref<72xf32, #tpu.memory_space<smem>>
    %274 = vector.broadcast %273 : f32 to vector<1x256xf32>
    %275 = arith.mulf %274, %249 : vector<1x256xf32>
    %276 = arith.addf %268, %275 : vector<1x256xf32>
    %c32 = arith.constant 32 : index
    %277 = memref.load %arg2[%c32] : memref<72xf32, #tpu.memory_space<smem>>
    %278 = vector.broadcast %277 : f32 to vector<1x256xf32>
    %279 = arith.mulf %278, %252 : vector<1x256xf32>
    %280 = arith.addf %272, %279 : vector<1x256xf32>
    %c68 = arith.constant 68 : index
    %281 = memref.load %arg2[%c68] : memref<72xf32, #tpu.memory_space<smem>>
    %282 = vector.broadcast %281 : f32 to vector<1x256xf32>
    %283 = arith.mulf %282, %252 : vector<1x256xf32>
    %284 = arith.addf %276, %283 : vector<1x256xf32>
    %c1_i32_55 = arith.constant 1 : i32
    %285 = vector.broadcast %c1_i32_55 : i32 to vector<1x256xi32>
    %286 = arith.cmpi sge, %10, %285 : vector<1x256xi32>
    %c14_i32_56 = arith.constant 14 : i32
    %287 = vector.broadcast %c14_i32_56 : i32 to vector<1x256xi32>
    %288 = arith.cmpi sle, %12, %287 : vector<1x256xi32>
    %289 = arith.andi %286, %288 : vector<1x256xi1>
    %c241_i32 = arith.constant 241 : i32
    %290 = tpu.dynamic_rotate %1 by %c241_i32 dim 1 : vector<1x256xf32>, i32 -> vector<1x256xf32>
    %cst_57 = arith.constant 0.000000e+00 : f32
    %291 = vector.broadcast %cst_57 : f32 to vector<1x256xf32>
    %292 = arith.select %289, %290, %291 : vector<1x256xi1>, vector<1x256xf32>
    %c241_i32_58 = arith.constant 241 : i32
    %293 = tpu.dynamic_rotate %3 by %c241_i32_58 dim 1 : vector<1x256xf32>, i32 -> vector<1x256xf32>
    %cst_59 = arith.constant 0.000000e+00 : f32
    %294 = vector.broadcast %cst_59 : f32 to vector<1x256xf32>
    %295 = arith.select %289, %293, %294 : vector<1x256xi1>, vector<1x256xf32>
    %c241_i32_60 = arith.constant 241 : i32
    %296 = tpu.dynamic_rotate %5 by %c241_i32_60 dim 1 : vector<1x256xf32>, i32 -> vector<1x256xf32>
    %cst_61 = arith.constant 0.000000e+00 : f32
    %297 = vector.broadcast %cst_61 : f32 to vector<1x256xf32>
    %298 = arith.select %289, %296, %297 : vector<1x256xi1>, vector<1x256xf32>
    %c241_i32_62 = arith.constant 241 : i32
    %299 = tpu.dynamic_rotate %7 by %c241_i32_62 dim 1 : vector<1x256xf32>, i32 -> vector<1x256xf32>
    %cst_63 = arith.constant 0.000000e+00 : f32
    %300 = vector.broadcast %cst_63 : f32 to vector<1x256xf32>
    %301 = arith.select %289, %299, %300 : vector<1x256xi1>, vector<1x256xf32>
    %c6 = arith.constant 6 : index
    %302 = memref.load %arg2[%c6] : memref<72xf32, #tpu.memory_space<smem>>
    %303 = vector.broadcast %302 : f32 to vector<1x256xf32>
    %304 = arith.mulf %303, %292 : vector<1x256xf32>
    %305 = arith.addf %280, %304 : vector<1x256xf32>
    %c42 = arith.constant 42 : index
    %306 = memref.load %arg2[%c42] : memref<72xf32, #tpu.memory_space<smem>>
    %307 = vector.broadcast %306 : f32 to vector<1x256xf32>
    %308 = arith.mulf %307, %292 : vector<1x256xf32>
    %309 = arith.addf %284, %308 : vector<1x256xf32>
    %c15 = arith.constant 15 : index
    %310 = memref.load %arg2[%c15] : memref<72xf32, #tpu.memory_space<smem>>
    %311 = vector.broadcast %310 : f32 to vector<1x256xf32>
    %312 = arith.mulf %311, %295 : vector<1x256xf32>
    %313 = arith.addf %305, %312 : vector<1x256xf32>
    %c51 = arith.constant 51 : index
    %314 = memref.load %arg2[%c51] : memref<72xf32, #tpu.memory_space<smem>>
    %315 = vector.broadcast %314 : f32 to vector<1x256xf32>
    %316 = arith.mulf %315, %295 : vector<1x256xf32>
    %317 = arith.addf %309, %316 : vector<1x256xf32>
    %c24 = arith.constant 24 : index
    %318 = memref.load %arg2[%c24] : memref<72xf32, #tpu.memory_space<smem>>
    %319 = vector.broadcast %318 : f32 to vector<1x256xf32>
    %320 = arith.mulf %319, %298 : vector<1x256xf32>
    %321 = arith.addf %313, %320 : vector<1x256xf32>
    %c60 = arith.constant 60 : index
    %322 = memref.load %arg2[%c60] : memref<72xf32, #tpu.memory_space<smem>>
    %323 = vector.broadcast %322 : f32 to vector<1x256xf32>
    %324 = arith.mulf %323, %298 : vector<1x256xf32>
    %325 = arith.addf %317, %324 : vector<1x256xf32>
    %c33 = arith.constant 33 : index
    %326 = memref.load %arg2[%c33] : memref<72xf32, #tpu.memory_space<smem>>
    %327 = vector.broadcast %326 : f32 to vector<1x256xf32>
    %328 = arith.mulf %327, %301 : vector<1x256xf32>
    %329 = arith.addf %321, %328 : vector<1x256xf32>
    %c69 = arith.constant 69 : index
    %330 = memref.load %arg2[%c69] : memref<72xf32, #tpu.memory_space<smem>>
    %331 = vector.broadcast %330 : f32 to vector<1x256xf32>
    %332 = arith.mulf %331, %301 : vector<1x256xf32>
    %333 = arith.addf %325, %332 : vector<1x256xf32>
    %c14_i32_64 = arith.constant 14 : i32
    %334 = vector.broadcast %c14_i32_64 : i32 to vector<1x256xi32>
    %335 = arith.cmpi sle, %12, %334 : vector<1x256xi32>
    %c240_i32 = arith.constant 240 : i32
    %336 = tpu.dynamic_rotate %1 by %c240_i32 dim 1 : vector<1x256xf32>, i32 -> vector<1x256xf32>
    %cst_65 = arith.constant 0.000000e+00 : f32
    %337 = vector.broadcast %cst_65 : f32 to vector<1x256xf32>
    %338 = arith.select %335, %336, %337 : vector<1x256xi1>, vector<1x256xf32>
    %c240_i32_66 = arith.constant 240 : i32
    %339 = tpu.dynamic_rotate %3 by %c240_i32_66 dim 1 : vector<1x256xf32>, i32 -> vector<1x256xf32>
    %cst_67 = arith.constant 0.000000e+00 : f32
    %340 = vector.broadcast %cst_67 : f32 to vector<1x256xf32>
    %341 = arith.select %335, %339, %340 : vector<1x256xi1>, vector<1x256xf32>
    %c240_i32_68 = arith.constant 240 : i32
    %342 = tpu.dynamic_rotate %5 by %c240_i32_68 dim 1 : vector<1x256xf32>, i32 -> vector<1x256xf32>
    %cst_69 = arith.constant 0.000000e+00 : f32
    %343 = vector.broadcast %cst_69 : f32 to vector<1x256xf32>
    %344 = arith.select %335, %342, %343 : vector<1x256xi1>, vector<1x256xf32>
    %c240_i32_70 = arith.constant 240 : i32
    %345 = tpu.dynamic_rotate %7 by %c240_i32_70 dim 1 : vector<1x256xf32>, i32 -> vector<1x256xf32>
    %cst_71 = arith.constant 0.000000e+00 : f32
    %346 = vector.broadcast %cst_71 : f32 to vector<1x256xf32>
    %347 = arith.select %335, %345, %346 : vector<1x256xi1>, vector<1x256xf32>
    %c7 = arith.constant 7 : index
    %348 = memref.load %arg2[%c7] : memref<72xf32, #tpu.memory_space<smem>>
    %349 = vector.broadcast %348 : f32 to vector<1x256xf32>
    %350 = arith.mulf %349, %338 : vector<1x256xf32>
    %351 = arith.addf %329, %350 : vector<1x256xf32>
    %c43 = arith.constant 43 : index
    %352 = memref.load %arg2[%c43] : memref<72xf32, #tpu.memory_space<smem>>
    %353 = vector.broadcast %352 : f32 to vector<1x256xf32>
    %354 = arith.mulf %353, %338 : vector<1x256xf32>
    %355 = arith.addf %333, %354 : vector<1x256xf32>
    %c16 = arith.constant 16 : index
    %356 = memref.load %arg2[%c16] : memref<72xf32, #tpu.memory_space<smem>>
    %357 = vector.broadcast %356 : f32 to vector<1x256xf32>
    %358 = arith.mulf %357, %341 : vector<1x256xf32>
    %359 = arith.addf %351, %358 : vector<1x256xf32>
    %c52 = arith.constant 52 : index
    %360 = memref.load %arg2[%c52] : memref<72xf32, #tpu.memory_space<smem>>
    %361 = vector.broadcast %360 : f32 to vector<1x256xf32>
    %362 = arith.mulf %361, %341 : vector<1x256xf32>
    %363 = arith.addf %355, %362 : vector<1x256xf32>
    %c25 = arith.constant 25 : index
    %364 = memref.load %arg2[%c25] : memref<72xf32, #tpu.memory_space<smem>>
    %365 = vector.broadcast %364 : f32 to vector<1x256xf32>
    %366 = arith.mulf %365, %344 : vector<1x256xf32>
    %367 = arith.addf %359, %366 : vector<1x256xf32>
    %c61 = arith.constant 61 : index
    %368 = memref.load %arg2[%c61] : memref<72xf32, #tpu.memory_space<smem>>
    %369 = vector.broadcast %368 : f32 to vector<1x256xf32>
    %370 = arith.mulf %369, %344 : vector<1x256xf32>
    %371 = arith.addf %363, %370 : vector<1x256xf32>
    %c34 = arith.constant 34 : index
    %372 = memref.load %arg2[%c34] : memref<72xf32, #tpu.memory_space<smem>>
    %373 = vector.broadcast %372 : f32 to vector<1x256xf32>
    %374 = arith.mulf %373, %347 : vector<1x256xf32>
    %375 = arith.addf %367, %374 : vector<1x256xf32>
    %c70 = arith.constant 70 : index
    %376 = memref.load %arg2[%c70] : memref<72xf32, #tpu.memory_space<smem>>
    %377 = vector.broadcast %376 : f32 to vector<1x256xf32>
    %378 = arith.mulf %377, %347 : vector<1x256xf32>
    %379 = arith.addf %371, %378 : vector<1x256xf32>
    %c14_i32_72 = arith.constant 14 : i32
    %380 = vector.broadcast %c14_i32_72 : i32 to vector<1x256xi32>
    %381 = arith.cmpi sle, %10, %380 : vector<1x256xi32>
    %c14_i32_73 = arith.constant 14 : i32
    %382 = vector.broadcast %c14_i32_73 : i32 to vector<1x256xi32>
    %383 = arith.cmpi sle, %12, %382 : vector<1x256xi32>
    %384 = arith.andi %381, %383 : vector<1x256xi1>
    %c239_i32 = arith.constant 239 : i32
    %385 = tpu.dynamic_rotate %1 by %c239_i32 dim 1 : vector<1x256xf32>, i32 -> vector<1x256xf32>
    %cst_74 = arith.constant 0.000000e+00 : f32
    %386 = vector.broadcast %cst_74 : f32 to vector<1x256xf32>
    %387 = arith.select %384, %385, %386 : vector<1x256xi1>, vector<1x256xf32>
    %c239_i32_75 = arith.constant 239 : i32
    %388 = tpu.dynamic_rotate %3 by %c239_i32_75 dim 1 : vector<1x256xf32>, i32 -> vector<1x256xf32>
    %cst_76 = arith.constant 0.000000e+00 : f32
    %389 = vector.broadcast %cst_76 : f32 to vector<1x256xf32>
    %390 = arith.select %384, %388, %389 : vector<1x256xi1>, vector<1x256xf32>
    %c239_i32_77 = arith.constant 239 : i32
    %391 = tpu.dynamic_rotate %5 by %c239_i32_77 dim 1 : vector<1x256xf32>, i32 -> vector<1x256xf32>
    %cst_78 = arith.constant 0.000000e+00 : f32
    %392 = vector.broadcast %cst_78 : f32 to vector<1x256xf32>
    %393 = arith.select %384, %391, %392 : vector<1x256xi1>, vector<1x256xf32>
    %c239_i32_79 = arith.constant 239 : i32
    %394 = tpu.dynamic_rotate %7 by %c239_i32_79 dim 1 : vector<1x256xf32>, i32 -> vector<1x256xf32>
    %cst_80 = arith.constant 0.000000e+00 : f32
    %395 = vector.broadcast %cst_80 : f32 to vector<1x256xf32>
    %396 = arith.select %384, %394, %395 : vector<1x256xi1>, vector<1x256xf32>
    %c8 = arith.constant 8 : index
    %397 = memref.load %arg2[%c8] : memref<72xf32, #tpu.memory_space<smem>>
    %398 = vector.broadcast %397 : f32 to vector<1x256xf32>
    %399 = arith.mulf %398, %387 : vector<1x256xf32>
    %400 = arith.addf %375, %399 : vector<1x256xf32>
    %c44 = arith.constant 44 : index
    %401 = memref.load %arg2[%c44] : memref<72xf32, #tpu.memory_space<smem>>
    %402 = vector.broadcast %401 : f32 to vector<1x256xf32>
    %403 = arith.mulf %402, %387 : vector<1x256xf32>
    %404 = arith.addf %379, %403 : vector<1x256xf32>
    %c17 = arith.constant 17 : index
    %405 = memref.load %arg2[%c17] : memref<72xf32, #tpu.memory_space<smem>>
    %406 = vector.broadcast %405 : f32 to vector<1x256xf32>
    %407 = arith.mulf %406, %390 : vector<1x256xf32>
    %408 = arith.addf %400, %407 : vector<1x256xf32>
    %c53 = arith.constant 53 : index
    %409 = memref.load %arg2[%c53] : memref<72xf32, #tpu.memory_space<smem>>
    %410 = vector.broadcast %409 : f32 to vector<1x256xf32>
    %411 = arith.mulf %410, %390 : vector<1x256xf32>
    %412 = arith.addf %404, %411 : vector<1x256xf32>
    %c26 = arith.constant 26 : index
    %413 = memref.load %arg2[%c26] : memref<72xf32, #tpu.memory_space<smem>>
    %414 = vector.broadcast %413 : f32 to vector<1x256xf32>
    %415 = arith.mulf %414, %393 : vector<1x256xf32>
    %416 = arith.addf %408, %415 : vector<1x256xf32>
    %c62 = arith.constant 62 : index
    %417 = memref.load %arg2[%c62] : memref<72xf32, #tpu.memory_space<smem>>
    %418 = vector.broadcast %417 : f32 to vector<1x256xf32>
    %419 = arith.mulf %418, %393 : vector<1x256xf32>
    %420 = arith.addf %412, %419 : vector<1x256xf32>
    %c35 = arith.constant 35 : index
    %421 = memref.load %arg2[%c35] : memref<72xf32, #tpu.memory_space<smem>>
    %422 = vector.broadcast %421 : f32 to vector<1x256xf32>
    %423 = arith.mulf %422, %396 : vector<1x256xf32>
    %424 = arith.addf %416, %423 : vector<1x256xf32>
    %c71 = arith.constant 71 : index
    %425 = memref.load %arg2[%c71] : memref<72xf32, #tpu.memory_space<smem>>
    %426 = vector.broadcast %425 : f32 to vector<1x256xf32>
    %427 = arith.mulf %426, %396 : vector<1x256xf32>
    %428 = arith.addf %420, %427 : vector<1x256xf32>
    %c0_81 = arith.constant 0 : index
    %429 = memref.load %arg5[%c0_81] : memref<1xf32, #tpu.memory_space<smem>>
    %430 = vector.broadcast %429 : f32 to vector<1x256xf32>
    %c0_82 = arith.constant 0 : index
    %431 = memref.load %arg4[%c0_82] : memref<2xf32, #tpu.memory_space<smem>>
    %cst_83 = arith.constant 0.000000e+00 : f32
    %432 = vector.broadcast %cst_83 : f32 to vector<1x256xf32>
    %433 = arith.maximumf %424, %432 : vector<1x256xf32>
    %434 = vector.broadcast %431 : f32 to vector<1x256xf32>
    %435 = arith.mulf %434, %433 : vector<1x256xf32>
    %436 = arith.addf %430, %435 : vector<1x256xf32>
    %c1_84 = arith.constant 1 : index
    %437 = memref.load %arg4[%c1_84] : memref<2xf32, #tpu.memory_space<smem>>
    %cst_85 = arith.constant 0.000000e+00 : f32
    %438 = vector.broadcast %cst_85 : f32 to vector<1x256xf32>
    %439 = arith.maximumf %428, %438 : vector<1x256xf32>
    %440 = vector.broadcast %437 : f32 to vector<1x256xf32>
    %441 = arith.mulf %440, %439 : vector<1x256xf32>
    %442 = arith.addf %436, %441 : vector<1x256xf32>
    %c0_86 = arith.constant 0 : index
    %c0_87 = arith.constant 0 : index
    %c0_88 = arith.constant 0 : index
    %443 = vector.load %arg6[%c0_86, %c0_87, %c0_88] : memref<1x1x256xf32, #tpu.memory_space<vmem>>, vector<1x1x256xf32>
    %444 = vector.shape_cast %443 : vector<1x1x256xf32> to vector<1x256xf32>
    %445 = vector.shape_cast %442 : vector<1x256xf32> to vector<1x1x256xf32>
    tpu.vector_store %arg6[%c0_86, %c0_87, %c0_88], %445 {strides = array<i32>} : memref<1x1x256xf32, #tpu.memory_space<vmem>>, vector<1x1x256xf32>,
    return
  }
  func.func @transform_0(%arg0: i32) -> (i32, i32, i32) {
    %c0_i32 = arith.constant 0 : i32
    %c0_i32_0 = arith.constant 0 : i32
    %c0_i32_1 = arith.constant 0 : i32
    return %arg0, %c0_i32, %c0_i32_0 : i32, i32, i32
  }
  func.func @transform_1(%arg0: i32) -> i32 {
    %c0_i32 = arith.constant 0 : i32
    %c0_i32_0 = arith.constant 0 : i32
    return %c0_i32 : i32
  }
  func.func @transform_2(%arg0: i32) -> i32 {
    %c0_i32 = arith.constant 0 : i32
    %c0_i32_0 = arith.constant 0 : i32
    return %c0_i32 : i32
  }
  func.func @transform_3(%arg0: i32) -> i32 {
    %c0_i32 = arith.constant 0 : i32
    %c0_i32_0 = arith.constant 0 : i32
    return %c0_i32 : i32
  }
  func.func @transform_4(%arg0: i32) -> i32 {
    %c0_i32 = arith.constant 0 : i32
    %c0_i32_0 = arith.constant 0 : i32
    return %c0_i32 : i32
  }
  func.func @transform_5(%arg0: i32) -> (i32, i32, i32) {
    %c0_i32 = arith.constant 0 : i32
    %c0_i32_0 = arith.constant 0 : i32
    %c0_i32_1 = arith.constant 0 : i32
    return %arg0, %c0_i32, %c0_i32_0 : i32, i32, i32
  }
}

</mosaic_0001>

<bundles_post_ra>
// kernel: tpu_custom_call.1
= control target key start
LH: loop header
LB: loop body
LE: loop exit
PB: predicated region body
PF: predicated region fallthrough
CT: control target
= control target key end

     0   :  { %s2704_s0 = inlined_call_operand.hbm [shape: f32[2,4,256], index: 0, kind: input, shape index: {}]   ;;  %s2705_s1 = inlined_call_operand.vmem [shape: f32[72], index: 1, kind: input, shape index: {}]   ;;  %s2706_s2 = inlined_call_operand.vmem [shape: f32[2], index: 2, kind: input, shape index: {}]   ;;  %s2707_s3 = inlined_call_operand.vmem [shape: f32[2], index: 3, kind: input, shape index: {}]   ;;  %s2708_s4 = inlined_call_operand.<no memory space> [shape: f32[1], index: 4, kind: input, shape index: {}]   ;;  %s2709_s5 = inlined_call_operand.hbm [shape: f32[2,1,256], index: 5, kind: output, shape index: {}]  }
   0x1   :  { %2710 = sst [smem:[#allocation16_spill]] %s2704_s0 }
   0x2   :  { %10 = sst [smem:[#allocation2]] %s2708_s4 }
   0x3   :  { %11 = vsyncpa [#allocation4], 0 }
   0x4   :  { %13 = vsyncpa [#allocation4 + $0x1], 0 }
   0x5   :  { %14 = vsyncpa [#allocation6], 0 }
   0x6   :  { %15 = vsyncpa [#allocation9], 0 }
   0x7   :  { %16 = vsyncpa [#allocation5], 0 }
   0x8   :  { %18 = vsyncpa [#allocation5 + $0x1], 0  ;;  %s1587_s20 = smov 0   ;;  %s1589_s21 = smov 0  }
   0x9   :  { %s1591_s22 = smov 0   ;;  %s1593_s23 = smov 0  }
   0xa LB: > { %s1608_s4 = sadd.s32 4294967295, %s1541_s23   ;;  %s1211_s24 = sadd.s32 4294967294, %s1541_s23   ;;  %s1541_s23 = sphi %s1593_s23, %s2753_s23   ;;  %s1537_s22 = sphi %s1591_s22, %s2752_s22   ;;  %s1533_s21 = sphi %s1589_s21, %s2751_s21   ;;  %s1529_s20 = sphi %s1587_s20, %s2750_s20  }
   0xb   : > { %p44_p0 = scmp.ne.s32.totalorder %s1533_s21, %s1529_s20  ;;  %p45_p1 = scmp.eq.s32.totalorder %s1608_s4, 0 }
   0xc   : > { %p152_p2 = scmp.eq.s32.totalorder %s1608_s4, 1  ;;  %p158_p3 = scmp.eq.s32.totalorder %s1211_s24, 1 }
   0xd   : > { %p1617_p4 = por %p45_p1, %p44_p0  ;;  %p1212_p5 = scmp.ge.s32.totalorder %s1541_s23, 1 }
   0xe   : > { %p1622_p6 = por %p158_p3, %p44_p0  ;;  %p165_p7 = scmp.lt.s32.totalorder %s1541_s23, 3 }
   0xf   : > { %s187_s29 = sshll.u32 %s2706_s2, 4  ;;  %s177_s8 = sshll.u32 %s2705_s1, 4  ;;  %s188_s29 = int_to_ptr.vmem [resolvable:$true] %s187_s29  ;;  %s178_s8 = int_to_ptr.vmem [resolvable:$true] %s177_s8 }
  0x10   : > { %p1630_p8 = pnand %p1212_p5, %p165_p7  ;;  %s197_s11 = sshll.u32 %s2707_s3, 4  ;;  %s198_s11 = int_to_ptr.vmem [resolvable:$true] %s197_s11 }
  0x11   : > { %s1543_s12 = smov [#allocation8]   ;;  %s1544_s13 = smov [#allocation7]  }
  0x12   : > { %p1323_p10 = pneg %p1630_p8  ;;  %s1545_s14 = smov [#allocation10]  }
  0x13   : > { %s1646_s15 = sadd.s32 1, %s1541_s23   ;;  %s31_s17 = sadd.s32 1, %s1537_s22 }
  0x14   : > { %p1324_p11 = pnand %p1323_p10, %p45_p1  ;;  %s28_s16 = ssub.s32 %s1541_s23, %s1646_s15 }
  0x15   : > { %p29_p12 = scmp.eq.s32.totalorder %s28_s16, 0  ;;  %p38_p13 = scmp.ne.s32.totalorder %s1537_s22, %s1533_s21 }
  0x16   : > { %1329 = dma.vmem_to_smem (!%p1324_p11), %s188_s29, 16, %s1543_s12, [#allocation9]  }
  0x17   : > { %1326 = dma.vmem_to_smem (!%p1324_p11), %s178_s8, 16, %s1544_s13, [#allocation6]  }
  0x18   : > { %1332 = dma.vmem_to_smem (!%p1324_p11), %s198_s11, 16, %s1545_s14, [#allocation9]  }
  0x19   : > { %p39_p0 = scmp.eq.s32.totalorder %s1541_s23, 0  ;;  %p1659_p3 = por %p152_p2, %p38_p13 }
  0x1a   : > { %s1655_s18 = scalar_select %p29_p12, %s1537_s22, %s31_s17  }
  0x1b   : > { %p1344_p5 = scmp.lt.s32.totalorder %s1541_s23, 2  ;;  %s211_s24 = sand.u32 1, %s1537_s22  }
  0x1c   : > { %s1306_s27 = sshll.u32 %s1541_s23, 3  ;;  %p40_p7 = por %p39_p0, %p38_p13 }
  0x1d   : > { %s1217_s28 = sshll.u32 %s211_s24, 3  ;;  %s2715_s0 = sld [smem:[#allocation16_spill]] }
  0x1e   : > { %s215_s9 = scalar_lea.vmem [#allocation3], %s1217_s28  ;;  %p1669_p10 = pnand %p1344_p5, %p40_p7 }
  0x1f   : > { %s224_s10 = sshll.u32 %s215_s9, 4  ;;  %s212_s12 = scalar_lea.sflag [#allocation4], %s211_s24  ;;  %s225_s10 = int_to_ptr.vmem [resolvable:$true] %s224_s10 }
  0x20   : > { %p1441_p11 = pneg %p1669_p10 }
  0x23   : > { %s220_s7 = scalar_lea.hbm %s2715_s0, %s1306_s27  ;;  %s1444_s27 = scalar_lea.hbm %s2715_s0, 16 }
  0x24   : > { %s222_s8 = sshll.u32 %s220_s7, 4  ;;  %s223_s8 = int_to_ptr.hbm [resolvable:$true] %s222_s8 }
  0x25   : > { %s1437_s13 = sshra.s32 %s223_s8, 4  ;;  %s1438_s13 = int_to_ptr.hbm [resolvable:$true] %s1437_s13 }
  0x26   : > { %s1439_s14 = scalar_lea.hbm %s1438_s13, 8  ;;  %p1445_p0 = scmp.lt.s32.totalorder %s1438_s13, %s2715_s0 }
  0x27   : > { %p1440_p2 = scmp.ne.s32.totalorder %s1438_s13, %s1439_s14  ;;  %p1446_p5 = scmp.lt.s32.totalorder %s1444_s27, %s1439_s14 }
  0x29   : > { %p1442_p12 = pnand %p1441_p11, %p1440_p2  ;;  %p1447_p7 = por %p1446_p5, %p1445_p0 }
  0x2b   : > { %p1443_p13 = pneg %p1442_p12 }
  0x2d   : > { %p1448_p9 = pnand %p1447_p7, %p1443_p13 }
  0x2f   : > { %1451 = shalt.err (!%p1448_p9)
}
  0x30   : > { %1336 = dma.hbm_to_vmem [thread:$0]  (!%p1669_p10), %s223_s8, 128, %s225_s10, %s212_s12  }
  0x31   : > { %233 = sbr.rel (%p1630_p8) target bundleno = 367 (0x16f), region = 40  ;;  %s1686_s24 = sand.u32 (!%p1630_p8), 1, %s1533_s21  }
  0x32   : > { %s1221_s6 = sshll.u32 (!%p1630_p8), %s1686_s24, 3  ;;  %s236_s7 = scalar_lea.sflag (!%p1630_p8), [#allocation4], %s1686_s24 }
  0x33   : > { %s239_s9 = scalar_lea.vmem (!%p1630_p8), [#allocation3], %s1221_s6 }
  0x36   : > { %1512 = dma.done.wait (%p1617_p4), %s236_s7, 128  }
  0x37   : > { %1514 = vsyncadd (%p1617_p4), %s236_s7, 4294967168 }
  0x38   : > { %1516 = dma.done.wait (%p45_p1), [#allocation6], 16  }
  0x39   : > { %1518 = vsyncadd (%p45_p1), [#allocation6], 4294967280 }
  0x3a   : > { %1520 = dma.done.wait (%p45_p1), [#allocation9], 32  }
  0x3b   : > { %1522 = vsyncadd (%p45_p1), [#allocation9], 4294967264 }
  0x3c   : > { %260 = sfence }
  0x3d   : > { %v1702_v0 = vld [vmem:[%s239_s9 + $0x1] ss:$4 sm:$0x3]  ;;  %v1707_v2 = vld [vmem:[%s239_s9] ss:$4 sm:$0x3]  ;;  %v290_v13 = vlaneseq }
  0x3e   : > { %v1705_v1 = vperm.slane %v1702_v0, 0  ;;  %v1710_v3 = vperm.slane %v1707_v2, 0  ;;  %s1546_s25 = smov 17   ;;  %v1713_v4 = vld [vmem:[%s239_s9 + $0x2] ss:$4 sm:$0x3] }
  0x3f   : > { %v1717_v5 = vperm.slane %v1713_v4, 0  ;;  %v1721_v6 = vperm.slane %v1702_v0, 1  ;;  %v1724_v7 = vperm.slane %v1707_v2, 1  ;;  %v1727_v8 = vperm.slane %v1713_v4, 1  ;;  %s1547_s30 = smov 16   ;;  %s1548_s8 = smov 15  }
  0x40   : > { %326 = vrot.lane.b32.xlu1 %v1705_v1, %s1546_s25  ;;  %312 = vrot.lane.b32.xlu0 %v1710_v3, %s1546_s25  ;;  %v1731_v9 = vld [vmem:[%s239_s9 + $0x3] ss:$4 sm:$0x3]  ;;  %s1549_s10 = smov 1   ;;  %s1550_s11 = smov 127   ;;  %v1773_v14 = vand.u32 127, %v290_v13 }
  0x41   : > { %339 = vrot.lane.b32.xlu2 %v1717_v5, %s1546_s25  ;;  %v1735_v10 = vperm.slane %v1731_v9, 1  ;;  %v1738_v11 = vperm.slane %v1731_v9, 0  ;;  %s1551_s12 = smov 113   ;;  %s1788_s13 = sld [smem:[#allocation7 + $0x12]] }
  0x42   : > { %vm316_vm0 = vcmp.lt.s32.totalorder %v1773_v14, 17  ;;  %v1791_v19 = vadd.s32 128, %v1773_v14  ;;  %s1793_s14 = sld [smem:[#allocation7 + $0x36]]  ;;  %v293_v21 = vand.u32 15, %v1773_v14  ;;  %v295_v22 = vshra.s32 %v1773_v14, 4 }
  0x43   : > { %s1797_s16 = sld [smem:[#allocation7 + $0x9]]  ;;  %vm412_vm7 = vcmp.lt.s32.totalorder %v1773_v14, 16  ;;  %vm497_vm10 = vcmp.lt.s32.totalorder %v1773_v14, 15  ;;  %vm578_vm13 = vcmp.lt.s32.totalorder %v1773_v14, 1  ;;  %vm739_vm14 = vcmp.lt.s32.totalorder %v1773_v14, 127 }
  0x44   : > { %s1801_s17 = sld [smem:[#allocation7 + $0x2d]]  ;;  %v294_v24 = vand.u32 15, %v1791_v19  ;;  %v296_v25 = vshra.s32 %v1791_v19, 4  ;;  %vm1821_vm1 = vcmp.ge.s32.totalorder %v293_v21, 1  ;;  %vm1827_vm2 = vcmp.ge.s32.totalorder %v295_v22, 1 }
  0x45   : > { %s1805_s27 = sld [smem:[#allocation8]]  ;;  %vm1851_vm5 = vmand %vm1821_vm1, %vm1827_vm2  ;;  %vm1988_vm8 = vcmp.le.s32.totalorder %v293_v21, 14  ;;  %vm2299_vm15 = vcmp.le.s32.totalorder %v295_v22, 14 }
  0x46   : > { %s1809_s28 = sld [smem:[#allocation7]]  ;;  %vm1833_vm3 = vcmp.ge.s32.totalorder %v294_v24, 1  ;;  %vm1839_vm4 = vcmp.ge.s32.totalorder %v296_v25, 1  ;;  %vm1994_vm9 = vcmp.le.s32.totalorder %v294_v24, 14  ;;  %vm2007_vm11 = vmand %vm1988_vm8, %vm1827_vm2 }
  0x47   : > { %s1813_s29 = sld [smem:[#allocation7 + $0x24]]  ;;  %vm1859_vm6 = vmand %vm1833_vm3, %vm1839_vm4  ;;  %v385_v33 = vstv %s1788_s13 }
  0x48   : > { %328 = vrot.lane.b32.xlu1 %v1721_v6, %s1546_s25  ;;  %314 = vrot.lane.b32.xlu0 %v1724_v7, %s1546_s25  ;;  %s1815_s6 = sld [smem:[#allocation8 + $0x1]]  ;;  %v391_v34 = vstv %s1793_s14  ;;  %vm2017_vm12 = vmand %vm1994_vm9, %vm1839_vm4 }
  0x49   : > { %341 = vrot.lane.b32.xlu2 %v1727_v8, %s1546_s25  ;;  %v373_v36 = vstv %s1797_s16  ;;  %s1871_s7 = sld [smem:[#allocation7 + $0x1b]] }
  0x4a   : > { %v379_v37 = vstv %s1801_s17  ;;  %s1881_s9 = sld [smem:[#allocation7 + $0x3f]] }
  0x4b   : > { %v298_v47 = vstv %s1805_s27  ;;  %s1942_s13 = sld [smem:[#allocation7 + $0x37]] }
  0x4c   : > { %v361_v41 = vstv %s1809_s28  ;;  %s1964_s14 = sld [smem:[#allocation7 + $0x1c]]  ;;  %s1553_s28 = smov 111  }
  0x4d   : > { %v367_v42 = vstv %s1813_s29  ;;  %s1968_s16 = sld [smem:[#allocation7 + $0x40]] }
  0x4e   : > { %v300_v48 = vstv %s1815_s6  ;;  %s1970_s17 = sld [smem:[#allocation7 + $0x2]] }
  0x4f   : > { %s1974_s27 = sld [smem:[#allocation7 + $0x26]] }
  0x50   : > { %354 = vrot.lane.b32.xlu1 %v1735_v10, %s1546_s25  ;;  %352 = vrot.lane.b32.xlu0 %v1738_v11, %s1546_s25  ;;  %s1552_s25 = smov 112   ;;  %s2023_s29 = sld [smem:[#allocation7 + $0xb]] }
  0x51   : > { %408 = vrot.lane.b32.xlu2 %v1710_v3, %s1547_s30  ;;  %s2033_s6 = sld [smem:[#allocation7 + $0x2f]] }
  0x52   : > { %s2431_s0 = sld [smem:[#allocation7 + $0x22]] }
  0x58   : > { %417 = vrot.lane.b32.xlu1 %v1705_v1, %s1547_s30  ;;  %410 = vrot.lane.b32.xlu0 %v1724_v7, %s1547_s30 }
  0x59   : > { %419 = vrot.lane.b32.xlu2 %v1721_v6, %s1547_s30 }
  0x60   : > { %427 = vrot.lane.b32.xlu1 %v1727_v8, %s1547_s30  ;;  %425 = vrot.lane.b32.xlu0 %v1717_v5, %s1547_s30 }
  0x61   : > { %433 = vrot.lane.b32.xlu2 %v1738_v11, %s1547_s30 }
  0x68   : > { %493 = vrot.lane.b32.xlu1 %v1710_v3, %s1548_s8  ;;  %435 = vrot.lane.b32.xlu0 %v1735_v10, %s1547_s30  ;;  %s1901_s30 = sld [smem:[#allocation7 + $0x1]] }
  0x69   : > { %495 = vrot.lane.b32.xlu2 %v1724_v7, %s1548_s8 }
  0x70   : > { %504 = vrot.lane.b32.xlu1 %v1721_v6, %s1548_s8  ;;  %502 = vrot.lane.b32.xlu0 %v1705_v1, %s1548_s8 }
  0x71   : > { %510 = vrot.lane.b32.xlu2 %v1717_v5, %s1548_s8 }
  0x78   : > { %518 = vrot.lane.b32.xlu1 %v1738_v11, %s1548_s8  ;;  %512 = vrot.lane.b32.xlu0 %v1727_v8, %s1548_s8 }
  0x79   : > { %520 = vrot.lane.b32.xlu2 %v1735_v10, %s1548_s8  ;;  %s1905_s8 = sld [smem:[#allocation7 + $0x25]] }
  0x80   : > { %576 = vrot.lane.b32.xlu1 %v1724_v7, %s1549_s10  ;;  %574 = vrot.lane.b32.xlu0 %v1710_v3, %s1549_s10 }
  0x81   : > { %583 = vrot.lane.b32.xlu2 %v1705_v1, %s1549_s10 }
  0x88   : > { %591 = vrot.lane.b32.xlu1 %v1717_v5, %s1549_s10  ;;  %585 = vrot.lane.b32.xlu0 %v1721_v6, %s1549_s10 }
  0x89   : > { %593 = vrot.lane.b32.xlu2 %v1727_v8, %s1549_s10 }
  0x90   : > { %601 = vrot.lane.b32.xlu1 %v1735_v10, %s1549_s10  ;;  %599 = vrot.lane.b32.xlu0 %v1738_v11, %s1549_s10  ;;  %s1907_s10 = sld [smem:[#allocation7 + $0xa]] }
  0x91   : > { %735 = vrot.lane.b32.xlu2 %v1710_v3, %s1550_s11 }
  0x98   : > { %744 = vrot.lane.b32.xlu1 %v1705_v1, %s1550_s11  ;;  %737 = vrot.lane.b32.xlu0 %v1724_v7, %s1550_s11 }
  0x99   : > { %746 = vrot.lane.b32.xlu2 %v1721_v6, %s1550_s11 }
  0x9b   : > { %v340_v12 = vpop.permute.xlu2 %339 }
  0xa0   : > { %754 = vrot.lane.b32.xlu1 %v1727_v8, %s1550_s11  ;;  %752 = vrot.lane.b32.xlu0 %v1717_v5, %s1550_s11 }
  0xa1   : > { %760 = vrot.lane.b32.xlu2 %v1738_v11, %s1550_s11 }
  0xa3   : > { %v342_v15 = vpop.permute.xlu2 %341 }
  0xa4   : > { %v343_v16 = vsel %vm316_vm0, %v340_v12, %v342_v15  ;;  %v344_v17 = vsel %vm316_vm0, %v342_v15, %v340_v12 }
  0xa5   : > { %v345_v50 = vsel %vm1851_vm5, %v344_v17, 0.0  ;;  %v346_v51 = vsel %vm1859_vm6, %v343_v16, 0.0 }
  0xa6   : > { %v386_v16 = vmul.f32 %v385_v33, %v345_v50  ;;  %v387_v17 = vmul.f32 %v385_v33, %v346_v51 }
  0xa8   : > { %820 = vrot.lane.b32.xlu1 %v1710_v3, %s1551_s12  ;;  %762 = vrot.lane.b32.xlu0 %v1735_v10, %s1550_s11  ;;  %s1909_s11 = sld [smem:[#allocation7 + $0x2e]] }
  0xa9   : > { %822 = vrot.lane.b32.xlu2 %v1724_v7, %s1551_s12 }
  0xab   : > { %v1786_v18 = vpop.permute.xlu2 %408 }
  0xb0   : > { %831 = vrot.lane.b32.xlu1 %v1721_v6, %s1551_s12  ;;  %829 = vrot.lane.b32.xlu0 %v1705_v1, %s1551_s12 }
  0xb1   : > { %837 = vrot.lane.b32.xlu2 %v1717_v5, %s1551_s12 }
  0xb2   : > { %v327_v20 = vpop.permute.xlu1 %326  ;;  %v313_v23 = vpop.permute.xlu0 %312 }
  0xb3   : > { %v1817_v26 = vpop.permute.xlu2 %419 }
  0xb8   : > { %845 = vrot.lane.b32.xlu1 %v1738_v11, %s1551_s12  ;;  %839 = vrot.lane.b32.xlu0 %v1727_v8, %s1551_s12 }
  0xb9   : > { %847 = vrot.lane.b32.xlu2 %v1735_v10, %s1551_s12  ;;  %s1932_s12 = sld [smem:[#allocation7 + $0x13]] }
  0xba   : > { %v329_v35 = vpop.permute.xlu1 %328  ;;  %v315_v40 = vpop.permute.xlu0 %314 }
  0xbb   : > { %v330_v38 = vsel %vm316_vm0, %v327_v20, %v329_v35  ;;  %v331_v39 = vsel %vm316_vm0, %v329_v35, %v327_v20  ;;  %v317_v43 = vsel %vm316_vm0, %v313_v23, %v315_v40  ;;  %v318_v44 = vsel %vm316_vm0, %v315_v40, %v313_v23  ;;  %v1889_v49 = vpop.permute.xlu2 %433 }
  0xbc   : > { %v332_v45 = vsel %vm1851_vm5, %v331_v39, 0.0  ;;  %v333_v46 = vsel %vm1859_vm6, %v330_v38, 0.0  ;;  %v319_v52 = vsel %vm1851_vm5, %v318_v44, 0.0  ;;  %v320_v53 = vsel %vm1859_vm6, %v317_v43, 0.0 }
  0xbd   : > { %v362_v54 = vmul.f32 %v361_v41, %v319_v52  ;;  %v363_v55 = vmul.f32 %v361_v41, %v320_v53  ;;  %v368_v56 = vmul.f32 %v367_v42, %v319_v52  ;;  %v369_v57 = vmul.f32 %v367_v42, %v320_v53 }
  0xbe   : > { %v374_v58 = vmul.f32 %v373_v36, %v332_v45  ;;  %v375_v59 = vmul.f32 %v373_v36, %v333_v46  ;;  %v380_v60 = vmul.f32 %v379_v37, %v332_v45  ;;  %v381_v61 = vmul.f32 %v379_v37, %v333_v46 }
  0xbf   : > { %v364_v62 = vadd.f32 %v362_v54, %v298_v47  ;;  %v365_v63 = vadd.f32 %v363_v55, %v298_v47  ;;  %v370_v12 = vadd.f32 %v368_v56, %v300_v48  ;;  %v371_v15 = vadd.f32 %v369_v57, %v300_v48 }
  0xc0   : > { %903 = vrot.lane.b32.xlu1 %v1724_v7, %s1552_s25  ;;  %901 = vrot.lane.b32.xlu0 %v1710_v3, %s1552_s25  ;;  %v392_v20 = vmul.f32 %v391_v34, %v345_v50  ;;  %v393_v23 = vmul.f32 %v391_v34, %v346_v51  ;;  %v397_v41 = vstv %s1871_s7  ;;  %v403_v42 = vstv %s1881_s9  ;;  %s2057_s7 = sld [smem:[#allocation7 + $0x14]] }
  0xc1   : > { %v376_v36 = vadd.f32 %v374_v58, %v364_v62  ;;  %v377_v37 = vadd.f32 %v375_v59, %v365_v63  ;;  %v382_v38 = vadd.f32 %v380_v60, %v370_v12  ;;  %v383_v39 = vadd.f32 %v381_v61, %v371_v15  ;;  %910 = vrot.lane.b32.xlu2 %v1705_v1, %s1552_s25  ;;  %s2061_s9 = sld [smem:[#allocation7 + $0x38]] }
  0xc2   : > { %v355_v35 = vpop.permute.xlu1 %354  ;;  %v353_v40 = vpop.permute.xlu0 %352  ;;  %v442_v58 = vstv %s1901_s30  ;;  %v454_v59 = vstv %s1907_s10  ;;  %v448_v60 = vstv %s1905_s8  ;;  %v460_v62 = vstv %s1909_s11  ;;  %s2092_s30 = sld [smem:[#allocation7 + $0x41]] }
  0xc3   : > { %v356_v33 = vsel %vm316_vm0, %v353_v40, %v355_v35  ;;  %v357_v34 = vsel %vm316_vm0, %v355_v35, %v353_v40  ;;  %v388_v43 = vadd.f32 %v386_v16, %v376_v36  ;;  %v389_v44 = vadd.f32 %v387_v17, %v377_v37  ;;  %v1919_v47 = vpop.permute.xlu2 %495  ;;  %s2094_s8 = sld [smem:[#allocation7 + $0x3]] }
  0xc4   : > { %v394_v45 = vadd.f32 %v392_v20, %v382_v38  ;;  %v395_v46 = vadd.f32 %v393_v23, %v383_v39  ;;  %v358_v48 = vsel %vm1851_vm5, %v357_v34, 0.0  ;;  %v359_v50 = vsel %vm1859_vm6, %v356_v33, 0.0  ;;  %s2096_s10 = sld [smem:[#allocation7 + $0x27]]  ;;  %vm2576_vm6 = vmand %vm1988_vm8, %vm2299_vm15 }
  0xc5   : > { %v398_v51 = vmul.f32 %v397_v41, %v358_v48  ;;  %v399_v52 = vmul.f32 %v397_v41, %v359_v50  ;;  %v404_v53 = vmul.f32 %v403_v42, %v358_v48  ;;  %v405_v54 = vmul.f32 %v403_v42, %v359_v50  ;;  %s2098_s11 = sld [smem:[#allocation7 + $0xc]] }
  0xc6   : > { %vm2305_vm0 = vcmp.le.s32.totalorder %v296_v25, 14  ;;  %vm988_vm5 = vcmp.lt.s32.totalorder %v1773_v14, 111 }
  0xc7   : > { %v400_v55 = vadd.f32 %v398_v51, %v388_v43  ;;  %v401_v56 = vadd.f32 %v399_v52, %v389_v44  ;;  %v406_v57 = vadd.f32 %v404_v53, %v394_v45  ;;  %v407_v31 = vadd.f32 %v405_v54, %v395_v46 }
  0xc8   : > { %918 = vrot.lane.b32.xlu1 %v1717_v5, %s1552_s25  ;;  %912 = vrot.lane.b32.xlu0 %v1721_v6, %s1552_s25  ;;  %v466_v52 = vstv %s1932_s12  ;;  %v472_v53 = vstv %s1942_s13  ;;  %s2102_s12 = sld [smem:[#allocation7 + $0x30]] }
  0xc9   : > { %920 = vrot.lane.b32.xlu2 %v1727_v8, %s1552_s25  ;;  %s2104_s13 = sld [smem:[#allocation7 + $0x15]] }
  0xca   : > { %v418_v32 = vpop.permute.xlu1 %417  ;;  %v411_v61 = vpop.permute.xlu0 %410 }
  0xcb   : > { %v421_v63 = vsel %vm412_vm7, %v418_v32, %v1817_v26  ;;  %v422_v12 = vsel %vm412_vm7, %v1817_v26, %v418_v32  ;;  %v413_v15 = vsel %vm412_vm7, %v1786_v18, %v411_v61  ;;  %v414_v16 = vsel %vm412_vm7, %v411_v61, %v1786_v18  ;;  %v1960_v37 = vpop.permute.xlu2 %510 }
  0xcc   : > { %v423_v17 = vsel %vm1827_vm2, %v422_v12, 0.0  ;;  %v424_v20 = vsel %vm1839_vm4, %v421_v63, 0.0  ;;  %v415_v26 = vsel %vm1827_vm2, %v414_v16, 0.0  ;;  %v416_v23 = vsel %vm1839_vm4, %v413_v15, 0.0 }
  0xcd   : > { %v455_v35 = vmul.f32 %v454_v59, %v423_v17  ;;  %v456_v36 = vmul.f32 %v454_v59, %v424_v20  ;;  %v443_v38 = vmul.f32 %v442_v58, %v415_v26  ;;  %v444_v39 = vmul.f32 %v442_v58, %v416_v23 }
  0xce   : > { %v449_v40 = vmul.f32 %v448_v60, %v415_v26  ;;  %v450_v18 = vmul.f32 %v448_v60, %v416_v23  ;;  %v461_v41 = vmul.f32 %v460_v62, %v423_v17  ;;  %v462_v42 = vmul.f32 %v460_v62, %v424_v20 }
  0xcf   : > { %v445_v33 = vadd.f32 %v443_v38, %v400_v55  ;;  %v446_v34 = vadd.f32 %v444_v39, %v401_v56  ;;  %v478_v17 = vstv %s1964_s14  ;;  %v527_v20 = vstv %s1970_s17  ;;  %s2109_s14 = sld [smem:[#allocation7 + $0x39]] }
  0xd0   : > { %v451_v43 = vadd.f32 %v449_v40, %v406_v57  ;;  %v452_v44 = vadd.f32 %v450_v18, %v407_v31  ;;  %928 = vrot.lane.b32.xlu1 %v1735_v10, %s1552_s25  ;;  %926 = vrot.lane.b32.xlu0 %v1738_v11, %s1552_s25  ;;  %v484_v26 = vstv %s1968_s16  ;;  %s2090_s25 = sld [smem:[#allocation7 + $0x1d]] }
  0xd1   : > { %v457_v45 = vadd.f32 %v455_v35, %v445_v33  ;;  %v458_v46 = vadd.f32 %v456_v36, %v446_v34  ;;  %984 = vrot.lane.b32.xlu2 %v1710_v3, %s1553_s28  ;;  %v533_v35 = vstv %s1974_s27  ;;  %s2111_s16 = sld [smem:[#allocation7 + $0x1e]] }
  0xd2   : > { %v463_v48 = vadd.f32 %v461_v41, %v451_v43  ;;  %v464_v50 = vadd.f32 %v462_v42, %v452_v44  ;;  %v428_v51 = vpop.permute.xlu1 %427  ;;  %v426_v54 = vpop.permute.xlu0 %425  ;;  %s2113_s17 = sld [smem:[#allocation7 + $0x4]] }
  0xd3   : > { %v429_v55 = vsel %vm412_vm7, %v426_v54, %v428_v51  ;;  %v430_v56 = vsel %vm412_vm7, %v428_v51, %v426_v54  ;;  %v1998_v58 = vpop.permute.xlu2 %520  ;;  %s2118_s27 = sld [smem:[#allocation7 + $0x42]] }
  0xd4   : > { %v431_v57 = vsel %vm1827_vm2, %v430_v56, 0.0  ;;  %v432_v31 = vsel %vm1839_vm4, %v429_v55, 0.0  ;;  %v539_v56 = vstv %s2023_s29  ;;  %s2165_s29 = sld [smem:[#allocation7 + $0xd]] }
  0xd5   : > { %v467_v59 = vmul.f32 %v466_v52, %v431_v57  ;;  %v468_v60 = vmul.f32 %v466_v52, %v432_v31  ;;  %v473_v61 = vmul.f32 %v472_v53, %v431_v57  ;;  %v474_v62 = vmul.f32 %v472_v53, %v432_v31 }
  0xd6   : > { %v545_v57 = vstv %s2033_s6  ;;  %s2179_s6 = sld [smem:[#allocation7 + $0x31]] }
  0xd7   : > { %v469_v21 = vadd.f32 %v467_v59, %v457_v45  ;;  %v470_v63 = vadd.f32 %v468_v60, %v458_v46  ;;  %v475_v12 = vadd.f32 %v473_v61, %v463_v48  ;;  %v476_v15 = vadd.f32 %v474_v62, %v464_v50 }
  0xd8   : > { %993 = vrot.lane.b32.xlu1 %v1705_v1, %s1553_s28  ;;  %986 = vrot.lane.b32.xlu0 %v1724_v7, %s1553_s28 }
  0xd9   : > { %995 = vrot.lane.b32.xlu2 %v1721_v6, %s1553_s28 }
  0xda   : > { %v494_v1 = vpop.permute.xlu1 %493  ;;  %v436_v23 = vpop.permute.xlu0 %435 }
  0xdb   : > { %v498_v7 = vsel %vm497_vm10, %v494_v1, %v1919_v47  ;;  %v499_v36 = vsel %vm497_vm10, %v1919_v47, %v494_v1  ;;  %v437_v38 = vsel %vm412_vm7, %v1889_v49, %v436_v23  ;;  %v438_v39 = vsel %vm412_vm7, %v436_v23, %v1889_v49  ;;  %v2051_v46 = vpop.permute.xlu2 %583  ;;  %vm2588_vm7 = vmand %vm1994_vm9, %vm2305_vm0 }
  0xdc   : > { %v500_v40 = vsel %vm2007_vm11, %v499_v36, 0.0  ;;  %v501_v18 = vsel %vm2017_vm12, %v498_v7, 0.0  ;;  %v439_v47 = vsel %vm1827_vm2, %v438_v39, 0.0  ;;  %v440_v6 = vsel %vm1839_vm4, %v437_v38, 0.0  ;;  %vm2373_vm4 = vmand %vm1821_vm1, %vm2299_vm15 }
  0xdd   : > { %v528_v41 = vmul.f32 %v527_v20, %v500_v40  ;;  %v529_v42 = vmul.f32 %v527_v20, %v501_v18  ;;  %v479_v33 = vmul.f32 %v478_v17, %v439_v47  ;;  %v480_v34 = vmul.f32 %v478_v17, %v440_v6 }
  0xde   : > { %v485_v43 = vmul.f32 %v484_v26, %v439_v47  ;;  %v486_v44 = vmul.f32 %v484_v26, %v440_v6  ;;  %v534_v49 = vmul.f32 %v533_v35, %v500_v40  ;;  %v535_v45 = vmul.f32 %v533_v35, %v501_v18 }
  0xdf   : > { %v481_v48 = vadd.f32 %v479_v33, %v469_v21  ;;  %v482_v50 = vadd.f32 %v480_v34, %v470_v63  ;;  %v551_v26 = vstv %s2057_s7  ;;  %v557_v23 = vstv %s2061_s9  ;;  %s2186_s7 = sld [smem:[#allocation7 + $0x16]] }
  0xe0   : > { %v487_v51 = vadd.f32 %v485_v43, %v475_v12  ;;  %v488_v28 = vadd.f32 %v486_v44, %v476_v15  ;;  %1003 = vrot.lane.b32.xlu1 %v1727_v8, %s1553_s28  ;;  %1001 = vrot.lane.b32.xlu0 %v1717_v5, %s1553_s28  ;;  %s2192_s9 = sld [smem:[#allocation7 + $0x3a]]  ;;  %vm824_vm2 = vcmp.lt.s32.totalorder %v1773_v14, 113 }
  0xe1   : > { %v530_v30 = vadd.f32 %v528_v41, %v481_v48  ;;  %v531_v52 = vadd.f32 %v529_v42, %v482_v50  ;;  %1009 = vrot.lane.b32.xlu2 %v1738_v11, %s1553_s28  ;;  %v563_v50 = vstv %s2090_s25  ;;  %s2199_s25 = sld [smem:[#allocation7 + $0x1f]] }
  0xe2   : > { %v536_v53 = vadd.f32 %v534_v49, %v487_v51  ;;  %v537_v54 = vadd.f32 %v535_v45, %v488_v28  ;;  %v505_v55 = vpop.permute.xlu1 %504  ;;  %v503_v31 = vpop.permute.xlu0 %502  ;;  %v569_v28 = vstv %s2092_s30  ;;  %s2203_s30 = sld [smem:[#allocation7 + $0x43]] }
  0xe3   : > { %v506_v8 = vsel %vm497_vm10, %v503_v31, %v505_v55  ;;  %v507_v5 = vsel %vm497_vm10, %v505_v55, %v503_v31  ;;  %v2077_v17 = vpop.permute.xlu2 %593  ;;  %v614_v55 = vstv %s2096_s10  ;;  %s2213_s10 = sld [smem:[#allocation7 + $0x29]] }
  0xe4   : > { %v508_v59 = vsel %vm2007_vm11, %v507_v5, 0.0  ;;  %v509_v60 = vsel %vm2017_vm12, %v506_v8, 0.0 }
  0xe5   : > { %v540_v61 = vmul.f32 %v539_v56, %v508_v59  ;;  %v541_v62 = vmul.f32 %v539_v56, %v509_v60  ;;  %v546_v21 = vmul.f32 %v545_v57, %v508_v59  ;;  %v547_v63 = vmul.f32 %v545_v57, %v509_v60 }
  0xe6   : > { %v626_v56 = vstv %s2102_s12  ;;  %v632_v57 = vstv %s2104_s13  ;;  %s2225_s12 = sld [smem:[#allocation7 + $0x32]] }
  0xe7   : > { %v542_v12 = vadd.f32 %v540_v61, %v530_v30  ;;  %v543_v11 = vadd.f32 %v541_v62, %v531_v52  ;;  %v548_v15 = vadd.f32 %v546_v21, %v536_v53  ;;  %v2073_v1 = vadd.f32 %v547_v63, %v537_v54  ;;  %s2228_s13 = sld [smem:[#allocation7 + $0x17]] }
  0xe8   : > { %1011 = vrot.lane.b32.xlu0 %v1735_v10, %s1553_s28  ;;  %v608_v53 = vstv %s2094_s8  ;;  %v656_v61 = vstv %s2113_s17  ;;  %s2149_s28 = sld [smem:[#allocation7 + $0x28]]  ;;  %v638_v63 = vstv %s2109_s14 }
  0xe9   : > { %s2210_s8 = sld [smem:[#allocation7 + $0x5]] }
  0xea   : > { %v519_v20 = vpop.permute.xlu1 %518  ;;  %v513_v35 = vpop.permute.xlu0 %512  ;;  %s2232_s14 = sld [smem:[#allocation7 + $0x3b]] }
  0xeb   : > { %v515_v7 = vsel %vm497_vm10, %v513_v35, %v1960_v37  ;;  %v2088_v6 = vpop.permute.xlu2 %735  ;;  %v514_v34 = vsel %vm497_vm10, %v1960_v37, %v513_v35  ;;  %v522_v49 = vsel %vm497_vm10, %v519_v20, %v1998_v58  ;;  %v523_v45 = vsel %vm497_vm10, %v1998_v58, %v519_v20  ;;  %s2245_s17 = sld [smem:[#allocation7 + $0x44]] }
  0xec   : > { %v516_v36 = vsel %vm2007_vm11, %v515_v7, 0.0  ;;  %v517_v44 = vsel %vm2017_vm12, %v514_v34, 0.0  ;;  %v524_v30 = vsel %vm2007_vm11, %v523_v45, 0.0  ;;  %v525_v52 = vsel %vm2017_vm12, %v522_v49, 0.0 }
  0xed   : > { %v552_v38 = vmul.f32 %v551_v26, %v516_v36  ;;  %v558_v39 = vmul.f32 %v557_v23, %v516_v36  ;;  %v553_v48 = vmul.f32 %v551_v26, %v517_v44  ;;  %v620_v58 = vstv %s2098_s11  ;;  %s2218_s11 = sld [smem:[#allocation7 + $0xe]] }
  0xee   : > { %v559_v31 = vmul.f32 %v557_v23, %v517_v44  ;;  %v564_v59 = vmul.f32 %v563_v50, %v524_v30  ;;  %v565_v60 = vmul.f32 %v563_v50, %v525_v52  ;;  %v570_v26 = vmul.f32 %v569_v28, %v524_v30 }
  0xef   : > { %v554_v40 = vadd.f32 %v552_v38, %v542_v12  ;;  %v2086_v18 = vadd.f32 %v558_v39, %v548_v15  ;;  %v555_v5 = vadd.f32 %v553_v48, %v543_v11  ;;  %v644_v12 = vstv %s2111_s16  ;;  %s2238_s16 = sld [smem:[#allocation7 + $0x20]] }
  0xf0   : > { %v650_v15 = vstv %s2118_s27  ;;  %v561_v7 = vadd.f32 %v559_v31, %v2073_v1  ;;  %v571_v36 = vmul.f32 %v569_v28, %v525_v52  ;;  %v2172_v38 = vmul.f32 %v656_v61, %v1707_v2  ;;  %s2248_s27 = sld [smem:[#allocation7 + $0x6]] }
  0xf1   : > { %v566_v39 = vadd.f32 %v564_v59, %v554_v40  ;;  %v572_v45 = vadd.f32 %v570_v26, %v2086_v18 }
  0xf2   : > { %v577_v47 = vpop.permute.xlu1 %576  ;;  %v575_v10 = vpop.permute.xlu0 %574  ;;  %v573_v18 = vadd.f32 %v571_v36, %v561_v7 }
  0xf3   : > { %v2100_v33 = vpop.permute.xlu2 %746  ;;  %v580_v51 = vsel %vm578_vm13, %v577_v47, %v575_v10  ;;  %v579_v8 = vsel %vm578_vm13, %v575_v10, %v577_v47  ;;  %v567_v47 = vadd.f32 %v565_v60, %v555_v5  ;;  %v676_v5 = vstv %s2165_s29  ;;  %s2258_s29 = sld [smem:[#allocation7 + $0xf]] }
  0xf4   : > { %v581_v24 = vsel %vm1821_vm1, %v580_v51, 0.0  ;;  %v582_v11 = vsel %vm1833_vm3, %v579_v8, 0.0 }
  0xf5   : > { %v609_v23 = vmul.f32 %v608_v53, %v581_v24  ;;  %v610_v34 = vmul.f32 %v608_v53, %v582_v11  ;;  %v615_v44 = vmul.f32 %v614_v55, %v581_v24  ;;  %v616_v48 = vmul.f32 %v614_v55, %v582_v11 }
  0xf6   : > { %v666_v53 = vstv %s2149_s28  ;;  %s2256_s28 = sld [smem:[#allocation7 + $0x2a]] }
  0xf7   : > { %v611_v40 = vadd.f32 %v609_v23, %v566_v39  ;;  %v612_v31 = vadd.f32 %v610_v34, %v567_v47  ;;  %v617_v8 = vadd.f32 %v615_v44, %v572_v45  ;;  %v659_v39 = vperm.slane %v2172_v38, 0 }
  0xf8   : > { %v660_v47 = vperm.slane %v2172_v38, 1  ;;  %v696_v34 = vstv %s2186_s7  ;;  %v706_v45 = vstv %s2192_s9  ;;  %s2263_s7 = sld [smem:[#allocation7 + $0x18]] }
  0xf9   : > { %s2271_s9 = sld [smem:[#allocation7 + $0x3c]] }
  0xfa   : > { %v592_v41 = vpop.permute.xlu1 %591  ;;  %v586_v42 = vpop.permute.xlu0 %585 }
  0xfb   : > { %v2135_v54 = vpop.permute.xlu2 %760  ;;  %v588_v16 = vsel %vm578_vm13, %v586_v42, %v2051_v46  ;;  %v587_v21 = vsel %vm578_vm13, %v2051_v46, %v586_v42  ;;  %v596_v46 = vsel %vm578_vm13, %v2077_v17, %v592_v41  ;;  %v595_v42 = vsel %vm578_vm13, %v592_v41, %v2077_v17 }
  0xfc   : > { %v589_v35 = vsel %vm1821_vm1, %v588_v16, 0.0  ;;  %v590_v10 = vsel %vm1833_vm3, %v587_v21, 0.0  ;;  %v597_v50 = vsel %vm1821_vm1, %v596_v46, 0.0  ;;  %v598_v41 = vsel %vm1833_vm3, %v595_v42, 0.0 }
  0xfd   : > { %v621_v1 = vmul.f32 %v620_v58, %v589_v35  ;;  %v622_v51 = vmul.f32 %v620_v58, %v590_v10  ;;  %v627_v17 = vmul.f32 %v626_v56, %v589_v35  ;;  %v628_v52 = vmul.f32 %v626_v56, %v590_v10 }
  0xfe   : > { %v633_v16 = vmul.f32 %v632_v57, %v597_v50  ;;  %v634_v56 = vmul.f32 %v632_v57, %v598_v41  ;;  %v639_v21 = vmul.f32 %v638_v63, %v597_v50  ;;  %v640_v23 = vmul.f32 %v638_v63, %v598_v41 }
  0xff   : > { %v623_v24 = vadd.f32 %v621_v1, %v611_v40  ;;  %v624_v60 = vadd.f32 %v622_v51, %v612_v31  ;;  %v629_v61 = vadd.f32 %v627_v17, %v617_v8  ;;  %v667_v35 = vmul.f32 %v666_v53, %v1707_v2 }
 0x100   : > { %v686_v57 = vstv %s2179_s6  ;;  %v677_v10 = vmul.f32 %v1702_v0, %v676_v5  ;;  %v726_v50 = vstv %s2203_s30  ;;  %v707_v53 = vmul.f32 %v1713_v4, %v706_v45  ;;  %s2260_s6 = sld [smem:[#allocation7 + $0x33]] }
 0x101   : > { %v635_v7 = vadd.f32 %v633_v16, %v623_v24  ;;  %v636_v2 = vadd.f32 %v634_v56, %v624_v60  ;;  %v641_v42 = vadd.f32 %v639_v21, %v629_v61  ;;  %v669_v1 = vperm.slane %v667_v35, 0  ;;  %s2320_s30 = sld [smem:[#allocation7 + $0x45]] }
 0x102   : > { %v602_v43 = vpop.permute.xlu1 %601  ;;  %v600_v37 = vpop.permute.xlu0 %599  ;;  %v670_v41 = vperm.slane %v667_v35, 1  ;;  %v2254_v31 = vmul.f32 %v1731_v9, %v726_v50  ;;  %v680_v8 = vperm.slane %v677_v10, 1  ;;  %v709_v61 = vperm.slane %v707_v53, 0 }
 0x103   : > { %v604_v49 = vsel %vm578_vm13, %v602_v43, %v600_v37  ;;  %v603_v28 = vsel %vm578_vm13, %v600_v37, %v602_v43  ;;  %v2194_v30 = vpop.permute.xlu2 %822  ;;  %v618_v37 = vadd.f32 %v616_v48, %v573_v18  ;;  %v716_v48 = vstv %s2199_s25  ;;  %s2311_s25 = sld [smem:[#allocation7 + $0x21]] }
 0x104   : > { %v605_v55 = vsel %vm1821_vm1, %v604_v49, 0.0  ;;  %v606_v59 = vsel %vm1833_vm3, %v603_v28, 0.0  ;;  %v687_v49 = vmul.f32 %v1702_v0, %v686_v57  ;;  %v697_v18 = vmul.f32 %v1713_v4, %v696_v34  ;;  %vm2393_vm1 = vmand %vm1833_vm3, %vm2305_vm0 }
 0x105   : > { %v645_v26 = vmul.f32 %v644_v12, %v605_v55  ;;  %v630_v11 = vadd.f32 %v628_v52, %v618_v37  ;;  %v646_v36 = vmul.f32 %v644_v12, %v606_v59  ;;  %v651_v46 = vmul.f32 %v650_v15, %v605_v55 }
 0x106   : > { %v652_v63 = vmul.f32 %v650_v15, %v606_v59  ;;  %v679_v0 = vperm.slane %v677_v10, 0  ;;  %v2251_v55 = vmul.f32 %v1731_v9, %v716_v48  ;;  %v689_v24 = vperm.slane %v687_v49, 0 }
 0x107   : > { %v647_v12 = vadd.f32 %v645_v26, %v635_v7  ;;  %v642_v44 = vadd.f32 %v640_v23, %v630_v11  ;;  %v648_v40 = vadd.f32 %v646_v36, %v636_v2  ;;  %v653_v15 = vadd.f32 %v651_v46, %v641_v42 }
 0x108   : > { %v690_v56 = vperm.slane %v687_v49, 1  ;;  %v699_v4 = vperm.slane %v697_v18, 0  ;;  %v700_v59 = vperm.slane %v697_v18, 1  ;;  %v710_v9 = vperm.slane %v707_v53, 1 }
 0x109   : > { %v654_v28 = vadd.f32 %v652_v63, %v642_v44  ;;  %v663_v52 = vadd.f32 %v659_v39, %v647_v12  ;;  %v664_v16 = vadd.f32 %v660_v47, %v648_v40  ;;  %v673_v37 = vadd.f32 %v669_v1, %v653_v15 }
 0x10a   : > { %v2151_v62 = vpop.permute.xlu1 %744  ;;  %v2159_v20 = vpop.permute.xlu0 %737  ;;  %v719_v21 = vperm.slane %v2251_v55, 0  ;;  %v720_v26 = vperm.slane %v2251_v55, 1  ;;  %v729_v11 = vperm.slane %v2254_v31, 0  ;;  %v769_v23 = vstv %s2210_s8  ;;  %s2327_s8 = sld [smem:[#allocation7 + $0x7]] }
 0x10b   : > { %v2242_v17 = vpop.permute.xlu2 %837  ;;  %v674_v5 = vadd.f32 %v670_v41, %v654_v28  ;;  %v683_v60 = vadd.f32 %v679_v0, %v663_v52  ;;  %v684_v7 = vadd.f32 %v680_v8, %v664_v16  ;;  %v693_v57 = vadd.f32 %v689_v24, %v673_v37 }
 0x10c   : > { %v730_v36 = vperm.slane %v2254_v31, 1  ;;  %v775_v46 = vstv %s2213_s10  ;;  %v781_v10 = vstv %s2218_s11  ;;  %v787_v63 = vstv %s2225_s12  ;;  %s2352_s10 = sld [smem:[#allocation7 + $0x2b]] }
 0x10d   : > { %v694_v47 = vadd.f32 %v690_v56, %v674_v5  ;;  %v793_v2 = vstv %s2228_s13  ;;  %v703_v42 = vadd.f32 %v699_v4, %v683_v60  ;;  %v740_v12 = vsel %vm739_vm14, %v2088_v6, %v2159_v20  ;;  %s2367_s11 = sld [smem:[#allocation7 + $0x10]] }
 0x10e   : > { %v799_v34 = vstv %s2232_s14  ;;  %v805_v44 = vstv %s2238_s16  ;;  %v741_v49 = vsel %vm739_vm14, %v2159_v20, %v2088_v6  ;;  %v748_v45 = vsel %vm739_vm14, %v2151_v62, %v2100_v33  ;;  %s2403_s12 = sld [smem:[#allocation7 + $0x34]] }
 0x10f   : > { %v811_v40 = vstv %s2245_s17  ;;  %v704_v48 = vadd.f32 %v700_v59, %v684_v7  ;;  %v713_v50 = vadd.f32 %v709_v61, %v693_v57  ;;  %v854_v20 = vstv %s2248_s27  ;;  %s2411_s13 = sld [smem:[#allocation7 + $0x19]] }
 0x110   : > { %v714_v22 = vadd.f32 %v710_v9, %v694_v47  ;;  %v742_v41 = vsel %vm1988_vm8, %v740_v12, 0.0  ;;  %v749_v19 = vsel %vm739_vm14, %v2100_v33, %v2151_v62  ;;  %v860_v25 = vstv %s2256_s28  ;;  %s2419_s14 = sld [smem:[#allocation7 + $0x3d]] }
 0x111   : > { %v723_v28 = vadd.f32 %v719_v21, %v703_v42  ;;  %v743_v18 = vsel %vm1994_vm9, %v741_v49, 0.0  ;;  %v750_v0 = vsel %vm1988_vm8, %v748_v45, 0.0  ;;  %v866_v52 = vstv %s2258_s29  ;;  %s2437_s16 = sld [smem:[#allocation7 + $0x46]] }
 0x112   : > { %v2201_v58 = vpop.permute.xlu1 %754  ;;  %v2205_v43 = vpop.permute.xlu0 %752  ;;  %v872_v55 = vstv %s2260_s6  ;;  %v878_v62 = vstv %s2263_s7  ;;  %v884_v31 = vstv %s2271_s9  ;;  %v724_v8 = vadd.f32 %v720_v26, %v704_v48  ;;  %s2463_s17 = sld [smem:[#allocation7 + $0x8]] }
 0x113   : > { %v2286_v1 = vpop.permute.xlu2 %847  ;;  %v756_v53 = vsel %vm739_vm14, %v2205_v43, %v2201_v58  ;;  %v733_v24 = vadd.f32 %v729_v11, %v713_v50  ;;  %v770_v16 = vmul.f32 %v769_v23, %v742_v41  ;;  %v751_v37 = vsel %vm1994_vm9, %v749_v19, 0.0  ;;  %s2470_s27 = sld [smem:[#allocation7 + $0x2c]] }
 0x114   : > { %v734_v5 = vadd.f32 %v730_v36, %v714_v22  ;;  %v771_v4 = vmul.f32 %v769_v23, %v743_v18  ;;  %v782_v59 = vmul.f32 %v781_v10, %v750_v0  ;;  %v757_v60 = vsel %vm739_vm14, %v2201_v58, %v2205_v43  ;;  %s2484_s28 = sld [smem:[#allocation7 + $0x11]] }
 0x115   : > { %v772_v61 = vadd.f32 %v770_v16, %v723_v28  ;;  %v776_v9 = vmul.f32 %v775_v46, %v742_v41  ;;  %v758_v21 = vsel %vm1988_vm8, %v756_v53, 0.0  ;;  %v777_v11 = vmul.f32 %v775_v46, %v743_v18  ;;  %s2489_s29 = sld [smem:[#allocation7 + $0x35]] }
 0x116   : > { %v783_v23 = vmul.f32 %v781_v10, %v751_v37  ;;  %v788_v7 = vmul.f32 %v787_v63, %v750_v0  ;;  %v789_v57 = vmul.f32 %v787_v63, %v751_v37  ;;  %v773_v58 = vadd.f32 %v771_v4, %v724_v8  ;;  %s2544_s6 = sld [smem:[#allocation7 + $0x1a]] }
 0x117   : > { %v778_v43 = vadd.f32 %v776_v9, %v733_v24  ;;  %v759_v36 = vsel %vm1994_vm9, %v757_v60, 0.0  ;;  %v779_v10 = vadd.f32 %v777_v11, %v734_v5  ;;  %v794_v63 = vmul.f32 %v793_v2, %v758_v21  ;;  %s2554_s7 = sld [smem:[#allocation7 + $0x3e]] }
 0x118   : > { %v890_v12 = vstv %s2311_s25  ;;  %v784_v49 = vadd.f32 %v782_v59, %v772_v61  ;;  %v896_v45 = vstv %s2320_s30  ;;  %v935_v48 = vstv %s2327_s8  ;;  %s2622_s9 = sld [smem:[#allocation7 + $0x23]] }
 0x119   : > { %v795_v50 = vmul.f32 %v793_v2, %v759_v36  ;;  %v800_v22 = vmul.f32 %v799_v34, %v758_v21  ;;  %v785_v28 = vadd.f32 %v783_v23, %v773_v58  ;;  %v790_v18 = vadd.f32 %v788_v7, %v778_v43  ;;  %s2650_s25 = sld [smem:[#allocation10]] }
 0x11a   : > { %v2234_v38 = vpop.permute.xlu1 %820  ;;  %v2240_v51 = vpop.permute.xlu0 %762  ;;  %v801_v0 = vmul.f32 %v799_v34, %v759_v36  ;;  %v791_v8 = vadd.f32 %v789_v57, %v779_v10  ;;  %v796_v24 = vadd.f32 %v794_v63, %v784_v49  ;;  %vm905_vm3 = vcmp.lt.s32.totalorder %v1773_v14, 112  ;;  %s2652_s30 = sld [smem:[#allocation2]] }
 0x11b   : > { %v764_v26 = vsel %vm739_vm14, %v2135_v54, %v2240_v51  ;;  %v765_v47 = vsel %vm739_vm14, %v2240_v51, %v2135_v54  ;;  %v2360_v46 = vpop.permute.xlu2 %910  ;;  %v825_v51 = vsel %vm824_vm2, %v2234_v38, %v2194_v30  ;;  %v826_v2 = vsel %vm824_vm2, %v2194_v30, %v2234_v38  ;;  %s2656_s8 = sld [smem:[#allocation10 + $0x1]] }
 0x11c   : > { %v766_v42 = vsel %vm1988_vm8, %v764_v26, 0.0  ;;  %v767_v41 = vsel %vm1994_vm9, %v765_v47, 0.0  ;;  %v827_v30 = vsel %vm2373_vm4, %v825_v51, 0.0  ;;  %v828_v37 = vsel %vm2393_vm1, %v826_v2, 0.0 }
 0x11d   : > { %v806_v29 = vmul.f32 %v805_v44, %v766_v42  ;;  %v807_v34 = vmul.f32 %v805_v44, %v767_v41  ;;  %v812_v16 = vmul.f32 %v811_v40, %v766_v42  ;;  %v797_v4 = vadd.f32 %v795_v50, %v785_v28 }
 0x11e   : > { %v802_v59 = vadd.f32 %v800_v22, %v790_v18  ;;  %v813_v60 = vmul.f32 %v811_v40, %v767_v41  ;;  %v941_v44 = vstv %s2352_s10  ;;  %v803_v61 = vadd.f32 %v801_v0, %v791_v8  ;;  %s1225_s10 = sshll.u32 %s1686_s24, 1 }
 0x11f   : > { %v808_v9 = vadd.f32 %v806_v29, %v796_v24  ;;  %v855_v21 = vmul.f32 %v854_v20, %v827_v30  ;;  %v861_v40 = vmul.f32 %v860_v25, %v827_v30  ;;  %v947_v11 = vstv %s2367_s11  ;;  %s1303_s11 = sshll.u32 %s1608_s4, 1  ;;  %s1095_s4 = scalar_lea.sflag [#allocation5], %s1686_s24 }
 0x120   : > { %v809_v23 = vadd.f32 %v807_v34, %v797_v4  ;;  %v814_v7 = vadd.f32 %v812_v16, %v802_v59  ;;  %v815_v43 = vadd.f32 %v813_v60, %v803_v61  ;;  %v862_v36 = vmul.f32 %v860_v25, %v828_v37 }
 0x121   : > { %v953_v63 = vstv %s2403_s12  ;;  %v857_v42 = vadd.f32 %v855_v21, %v808_v9  ;;  %v965_v18 = vstv %s2419_s14  ;;  %v971_v8 = vstv %s2431_s0  ;;  %s2632_s0 = sld [smem:[#allocation7 + $0x47]]  ;;  %s1105_s14 = scalar_lea.hbm %s2709_s5, %s1303_s11 }
 0x122   : > { %v2269_v35 = vpop.permute.xlu1 %831  ;;  %v2275_v39 = vpop.permute.xlu0 %829  ;;  %v863_v2 = vadd.f32 %v861_v40, %v814_v7  ;;  %v864_v0 = vadd.f32 %v862_v36, %v815_v43  ;;  %v977_v24 = vstv %s2437_s16  ;;  %v1030_v7 = vstv %s2484_s28  ;;  %s282_s16 = scalar_lea.vmem [#allocation11], %s1225_s10 }
 0x123   : > { %v833_v38 = vsel %vm824_vm2, %v2275_v39, %v2269_v35  ;;  %v834_v5 = vsel %vm824_vm2, %v2269_v35, %v2275_v39  ;;  %v856_v39 = vmul.f32 %v854_v20, %v828_v37  ;;  %v921_v58 = vpop.permute.xlu2 %920  ;;  %v1042_v15 = vstv %s2544_s6 }
 0x124   : > { %v835_v35 = vsel %vm2373_vm4, %v833_v38, 0.0  ;;  %v836_v26 = vsel %vm2393_vm1, %v834_v5, 0.0  ;;  %vm1086_vm8 = vcmask 1040384   ;;  %vm1091_vm9 = vcmp.lt.s32.totalorder %v290_v13, 256 }
 0x125   : > { %v867_v47 = vmul.f32 %v866_v52, %v835_v35  ;;  %v868_v49 = vmul.f32 %v866_v52, %v836_v26  ;;  %v873_v51 = vmul.f32 %v872_v55, %v835_v35  ;;  %v858_v41 = vadd.f32 %v856_v39, %v809_v23 }
 0x126   : > { %v874_v28 = vmul.f32 %v872_v55, %v836_v26  ;;  %v1018_v26 = vstv %s2463_s17  ;;  %v1024_v23 = vstv %s2470_s27  ;;  %s1107_s17 = sshll.u32 %s282_s16, 4  ;;  %s1109_s27 = sshll.u32 %s1105_s14, 4  ;;  %s1108_s17 = int_to_ptr.vmem [resolvable:$true] %s1107_s17  ;;  %s1110_s27 = int_to_ptr.hbm [resolvable:$true] %s1109_s27 }
 0x127   : > { %v869_v29 = vadd.f32 %v867_v47, %v857_v42  ;;  %v870_v38 = vadd.f32 %v868_v49, %v858_v41  ;;  %v875_v34 = vadd.f32 %v873_v51, %v863_v2  ;;  %s1481_s28 = sshra.s32 %s1110_s27, 4  ;;  %s1482_s28 = int_to_ptr.hbm [resolvable:$true] %s1481_s28 }
 0x128   : > { %v876_v5 = vadd.f32 %v874_v28, %v864_v0  ;;  %p1488_p9 = scmp.lt.s32.totalorder %s1482_s28, %s2709_s5 }
 0x12a   : > { %v2334_v33 = vpop.permute.xlu1 %845  ;;  %v2340_v56 = vpop.permute.xlu0 %839 }
 0x12b   : > { %v841_v57 = vsel %vm824_vm2, %v2242_v17, %v2340_v56  ;;  %v842_v20 = vsel %vm824_vm2, %v2340_v56, %v2242_v17  ;;  %v959_v17 = vstv %s2411_s13  ;;  %v849_v52 = vsel %vm824_vm2, %v2334_v33, %v2286_v1 }
 0x12c   : > { %v843_v25 = vsel %vm2373_vm4, %v841_v57, 0.0  ;;  %v844_v56 = vsel %vm2393_vm1, %v842_v20, 0.0  ;;  %v850_v22 = vsel %vm824_vm2, %v2286_v1, %v2334_v33  ;;  %v851_v30 = vsel %vm2373_vm4, %v849_v52, 0.0 }
 0x12d   : > { %v879_v1 = vmul.f32 %v878_v62, %v843_v25  ;;  %v880_v33 = vmul.f32 %v878_v62, %v844_v56  ;;  %v852_v55 = vsel %vm2393_vm1, %v850_v22, 0.0  ;;  %v885_v16 = vmul.f32 %v884_v31, %v843_v25 }
 0x12e   : > { %v886_v37 = vmul.f32 %v884_v31, %v844_v56  ;;  %v891_v54 = vmul.f32 %v890_v12, %v851_v30  ;;  %v892_v27 = vmul.f32 %v890_v12, %v852_v55  ;;  %v897_v31 = vmul.f32 %v896_v45, %v851_v30  ;;  %v985_v12 = vpop.permute.xlu2 %984 }
 0x12f   : > { %v898_v59 = vmul.f32 %v896_v45, %v852_v55  ;;  %v881_v61 = vadd.f32 %v879_v1, %v869_v29  ;;  %v882_v9 = vadd.f32 %v880_v33, %v870_v38  ;;  %v887_v35 = vadd.f32 %v885_v16, %v875_v34 }
 0x130   : > { %v888_v39 = vadd.f32 %v886_v37, %v876_v5  ;;  %v1036_v57 = vstv %s2489_s29  ;;  %v1066_v34 = vstv %s2652_s30  ;;  %s1483_s29 = scalar_lea.hbm %s1482_s28, 2 }
 0x131   : > { %v894_v25 = vadd.f32 %v892_v27, %v882_v9  ;;  %v899_v56 = vadd.f32 %v897_v31, %v887_v35  ;;  %p1484_p1 = scmp.ne.s32.totalorder %s1482_s28, %s1483_s29 }
 0x132   : > { %v2401_v19 = vpop.permute.xlu1 %903  ;;  %v2409_v53 = vpop.permute.xlu0 %901  ;;  %v900_v52 = vadd.f32 %v898_v59, %v888_v39 }
 0x133   : > { %v906_v4 = vsel %vm905_vm3, %v2409_v53, %v2401_v19  ;;  %v907_v62 = vsel %vm905_vm3, %v2401_v19, %v2409_v53  ;;  %p1485_p4 = pnand %p1484_p1, %p1659_p3 }
 0x134   : > { %v908_v45 = vsel %vm2299_vm15, %v906_v4, 0.0  ;;  %v909_v40 = vsel %vm2305_vm0, %v907_v62, 0.0 }
 0x135   : > { %v936_v47 = vmul.f32 %v935_v48, %v908_v45  ;;  %v937_v42 = vmul.f32 %v935_v48, %v909_v40  ;;  %v942_v49 = vmul.f32 %v941_v44, %v908_v45  ;;  %v943_v51 = vmul.f32 %v941_v44, %v909_v40  ;;  %p1486_p8 = pneg %p1485_p4 }
 0x136   : > { %v996_v4 = vpop.permute.xlu2 %995 }
 0x137   : > { %v939_v1 = vadd.f32 %v937_v42, %v894_v25  ;;  %v945_v33 = vadd.f32 %v943_v51, %v900_v52 }
 0x13a   : > { %v919_v10 = vpop.permute.xlu1 %918  ;;  %v913_v50 = vpop.permute.xlu0 %912 }
 0x13b   : > { %v914_v19 = vsel %vm905_vm3, %v2360_v46, %v913_v50  ;;  %v915_v53 = vsel %vm905_vm3, %v913_v50, %v2360_v46  ;;  %v922_v43 = vsel %vm905_vm3, %v919_v10, %v921_v58  ;;  %v923_v36 = vsel %vm905_vm3, %v921_v58, %v919_v10 }
 0x13c   : > { %v916_v46 = vsel %vm2299_vm15, %v914_v19, 0.0  ;;  %v917_v20 = vsel %vm2305_vm0, %v915_v53, 0.0  ;;  %v893_v50 = vadd.f32 %v891_v54, %v881_v61  ;;  %v924_v22 = vsel %vm2299_vm15, %v922_v43, 0.0 }
 0x13d   : > { %v948_v58 = vmul.f32 %v947_v11, %v916_v46  ;;  %v949_v10 = vmul.f32 %v947_v11, %v917_v20  ;;  %v925_v48 = vsel %vm2305_vm0, %v923_v36, 0.0  ;;  %v954_v44 = vmul.f32 %v953_v63, %v916_v46 }
 0x13e   : > { %v955_v41 = vmul.f32 %v953_v63, %v917_v20  ;;  %v938_v29 = vadd.f32 %v936_v47, %v893_v50  ;;  %v944_v11 = vadd.f32 %v942_v49, %v899_v56  ;;  %v960_v55 = vmul.f32 %v959_v17, %v924_v22 }
 0x13f   : > { %v961_v38 = vmul.f32 %v959_v17, %v925_v48  ;;  %v951_v5 = vadd.f32 %v949_v10, %v939_v1  ;;  %v966_v27 = vmul.f32 %v965_v18, %v924_v22  ;;  %v967_v31 = vmul.f32 %v965_v18, %v925_v48 }
 0x140   : > { %v950_v37 = vadd.f32 %v948_v58, %v938_v29  ;;  %v956_v62 = vadd.f32 %v954_v44, %v944_v11  ;;  %v957_v54 = vadd.f32 %v955_v41, %v945_v33  ;;  %v1048_v61 = vstv %s2554_s7  ;;  %v1010_v11 = vpop.permute.xlu2 %1009 }
 0x142   : > { %v929_v60 = vpop.permute.xlu1 %928  ;;  %v927_v21 = vpop.permute.xlu0 %926  ;;  %v962_v53 = vadd.f32 %v960_v55, %v950_v37  ;;  %v968_v39 = vadd.f32 %v966_v27, %v956_v62  ;;  %v969_v45 = vadd.f32 %v967_v31, %v957_v54 }
 0x143   : > { %v930_v2 = vsel %vm905_vm3, %v927_v21, %v929_v60  ;;  %v931_v28 = vsel %vm905_vm3, %v929_v60, %v927_v21  ;;  %v963_v21 = vadd.f32 %v961_v38, %v951_v5  ;;  %v1054_v38 = vstv %s2622_s9  ;;  %s1487_s9 = scalar_lea.hbm %s2709_s5, 4 }
 0x144   : > { %v932_v17 = vsel %vm2299_vm15, %v930_v2, 0.0  ;;  %v933_v3 = vsel %vm2305_vm0, %v931_v28, 0.0  ;;  %p1489_p10 = scmp.lt.s32.totalorder %s1487_s9, %s1483_s29 }
 0x145   : > { %v972_v6 = vmul.f32 %v971_v8, %v932_v17  ;;  %v973_v9 = vmul.f32 %v971_v8, %v933_v3  ;;  %v979_v35 = vmul.f32 %v977_v24, %v933_v3 }
 0x146   : > { %p1490_p2 = por %p1489_p10, %p1488_p9 }
 0x147   : > { %v975_v42 = vadd.f32 %v973_v9, %v963_v21  ;;  %v981_v50 = vadd.f32 %v979_v35, %v969_v45  ;;  %v1070_v9 = vstv %s2650_s25  ;;  %v1078_v21 = vstv %s2656_s8 }
 0x148   : > { %p1491_p11 = pnand %p1490_p2, %p1486_p8 }
 0x14a   : > { %v994_v0 = vpop.permute.xlu1 %993  ;;  %v987_v63 = vpop.permute.xlu0 %986 }
 0x14b   : > { %v989_v32 = vsel %vm988_vm5, %v985_v12, %v987_v63  ;;  %v990_v16 = vsel %vm988_vm5, %v987_v63, %v985_v12  ;;  %v997_v19 = vsel %vm988_vm5, %v994_v0, %v996_v4  ;;  %v998_v18 = vsel %vm988_vm5, %v996_v4, %v994_v0 }
 0x14c   : > { %v991_v59 = vsel %vm2576_vm6, %v989_v32, 0.0  ;;  %v992_v60 = vsel %vm2588_vm7, %v990_v16, 0.0  ;;  %v978_v12 = vmul.f32 %v977_v24, %v932_v17  ;;  %v999_v36 = vsel %vm2576_vm6, %v997_v19, 0.0 }
 0x14d   : > { %v1019_v40 = vmul.f32 %v1018_v26, %v991_v59  ;;  %v1020_v46 = vmul.f32 %v1018_v26, %v992_v60  ;;  %v1025_v8 = vmul.f32 %v1024_v23, %v991_v59  ;;  %v1026_v43 = vmul.f32 %v1024_v23, %v992_v60 }
 0x14e   : > { %v1000_v47 = vsel %vm2588_vm7, %v998_v18, 0.0  ;;  %v974_v26 = vadd.f32 %v972_v6, %v962_v53  ;;  %v980_v51 = vadd.f32 %v978_v12, %v968_v39  ;;  %v1031_v10 = vmul.f32 %v1030_v7, %v999_v36 }
 0x14f   : > { %v1022_v58 = vadd.f32 %v1020_v46, %v975_v42  ;;  %v1032_v22 = vmul.f32 %v1030_v7, %v1000_v47  ;;  %v1028_v44 = vadd.f32 %v1026_v43, %v981_v50  ;;  %v1037_v41 = vmul.f32 %v1036_v57, %v999_v36 }
 0x150   : > { %v1021_v52 = vadd.f32 %v1019_v40, %v974_v26  ;;  %v1027_v48 = vadd.f32 %v1025_v8, %v980_v51  ;;  %v1038_v2 = vmul.f32 %v1036_v57, %v1000_v47  ;;  %v1060_v32 = vstv %s2632_s0 }
 0x151   : > { %v1034_v63 = vadd.f32 %v1032_v22, %v1022_v58 }
 0x152   : > { %v1004_v20 = vpop.permute.xlu1 %1003  ;;  %v1002_v24 = vpop.permute.xlu0 %1001  ;;  %v1033_v33 = vadd.f32 %v1031_v10, %v1021_v52  ;;  %v1039_v7 = vadd.f32 %v1037_v41, %v1027_v48  ;;  %v1040_v55 = vadd.f32 %v1038_v2, %v1028_v44 }
 0x153   : > { %v1005_v49 = vsel %vm988_vm5, %v1002_v24, %v1004_v20  ;;  %v1006_v23 = vsel %vm988_vm5, %v1004_v20, %v1002_v24 }
 0x154   : > { %v1007_v25 = vsel %vm2576_vm6, %v1005_v49, 0.0  ;;  %v1008_v56 = vsel %vm2588_vm7, %v1006_v23, 0.0 }
 0x155   : > { %v1043_v28 = vmul.f32 %v1042_v15, %v1007_v25  ;;  %v1044_v0 = vmul.f32 %v1042_v15, %v1008_v56  ;;  %v1049_v29 = vmul.f32 %v1048_v61, %v1007_v25  ;;  %v1050_v1 = vmul.f32 %v1048_v61, %v1008_v56 }
 0x157   : > { %v1045_v37 = vadd.f32 %v1043_v28, %v1033_v33  ;;  %v1046_v57 = vadd.f32 %v1044_v0, %v1034_v63  ;;  %v1051_v3 = vadd.f32 %v1049_v29, %v1039_v7  ;;  %v1052_v4 = vadd.f32 %v1050_v1, %v1040_v55 }
 0x15a   : > { %v1012_v16 = vpop.permute.xlu0 %1011 }
 0x15b   : > { %v1013_v5 = vsel %vm988_vm5, %v1010_v11, %v1012_v16  ;;  %v1014_v17 = vsel %vm988_vm5, %v1012_v16, %v1010_v11 }
 0x15c   : > { %v1015_v62 = vsel %vm2576_vm6, %v1013_v5, 0.0  ;;  %v1016_v54 = vsel %vm2588_vm7, %v1014_v17, 0.0 }
 0x15d   : > { %v1055_v27 = vmul.f32 %v1054_v38, %v1015_v62  ;;  %v1056_v31 = vmul.f32 %v1054_v38, %v1016_v54  ;;  %v1061_v59 = vmul.f32 %v1060_v32, %v1015_v62  ;;  %v1062_v60 = vmul.f32 %v1060_v32, %v1016_v54 }
 0x15f   : > { %v1057_v15 = vadd.f32 %v1055_v27, %v1045_v37  ;;  %v1058_v61 = vadd.f32 %v1056_v31, %v1046_v57  ;;  %v1063_v14 = vadd.f32 %v1061_v59, %v1051_v3  ;;  %v1064_v6 = vadd.f32 %v1062_v60, %v1052_v4 }
 0x161   : > { %v1068_v19 = vmax.f32 %v1057_v15, 0.0  ;;  %v1069_v18 = vmax.f32 %v1058_v61, 0.0  ;;  %v1076_v30 = vmax.f32 %v1063_v14, 0.0  ;;  %v1077_v53 = vmax.f32 %v1064_v6, 0.0 }
 0x163   : > { %v1071_v12 = vmul.f32 %v1070_v9, %v1068_v19  ;;  %v1072_v35 = vmul.f32 %v1070_v9, %v1069_v18  ;;  %v1079_v40 = vmul.f32 %v1078_v21, %v1076_v30  ;;  %v1080_v46 = vmul.f32 %v1078_v21, %v1077_v53 }
 0x165   : > { %v1073_v39 = vadd.f32 %v1071_v12, %v1066_v34  ;;  %v1074_v45 = vadd.f32 %v1072_v35, %v1066_v34 }
 0x167   : > { %v1082_v20 = vadd.f32 %v1080_v46, %v1074_v45  ;;  %v1081_v8 = vadd.f32 %v1079_v40, %v1073_v39 }
 0x169   : > { %v1085_v43 = vrot.slane %v1082_v20, 7 }
 0x16b   : > { %v1087_v36 = vsel %vm1086_vm8, %v1081_v8, %v1085_v43 }
 0x16c   : > { %1093 = vst.msk [vmem:[%s282_s16] sm:$0x3] %vm1091_vm9, %v1087_v36 }
 0x16d   : > { %1494 = shalt.err (!%p1491_p11)
}
 0x16e   : > { %1321 = dma.vmem_to_hbm [thread:$0]  (%p1659_p3), %s1108_s17, 32, %s1110_s27, %s1095_s4  }
 0x16f PF: > { %s1121_s24 = sand.u32 1, %s1529_s20   ;;  %p2749_p12 = scmp.ge.s32.totalorder %s1541_s23, 2 }
 0x170   : > { %s1122_s30 = scalar_lea.sflag [#allocation5], %s1121_s24 }
 0x171   : > { %p1338_p13 = pnand %p2749_p12, %p1622_p6 }
 0x173   : > { %p1339_p0 = pneg %p1338_p13 }
 0x175   : > { %1524 = dma.done.wait (%p1339_p0), %s1122_s30, 32  }
 0x176   : > { %1526 = vsyncadd (%p1339_p0), %s1122_s30, 4294967264  ;;  %p21_p5 = scmp.ge.s32.totalorder %s1646_s15, 4   ;;  %s2750_s20 = smov %s1533_s21 }
 0x177   : > { %s2751_s21 = smov %s1537_s22  ;;  %s2752_s22 = smov %s1655_s18 }
 0x178   : > { %s2753_s23 = smov %s1646_s15  ;;  %23 = sbr.rel (!%p21_p5) target bundleno = 10 (0xa), region = 101 }
 0x17d   :  { %1128 = vsyncpa [#allocation4], 1 }
 0x17e   :  { %1130 = vsyncpa [#allocation4 + $0x1], 1 }
 0x17f   :  { %1131 = vsyncpa [#allocation5], 1 }
 0x180   :  { %1133 = vsyncpa [#allocation5 + $0x1], 1 }
 0x181   :  { %1134 = vsyncpa [#allocation6], 1 }
 0x182   :  { %1136 = vsyncpa [#allocation6 + $0x1], 1 }
 0x183   :  { %1137 = vsyncpa [#allocation9], 1 }

</bundles_post_ra>
